<compile_context>
chip_gen: v7x
topology: tpu7x:2x2x1
jax: 0.10.0
libtpu: 0.0.40
codegen_flags: <defaults>
</compile_context>

<pallas_src>
import math
from typing import NamedTuple, Tuple

import numpy as np
import jax
import jax.numpy as jnp
from jax import lax
from jax.experimental import pallas as pl
from jax.experimental.pallas import tpu as pltpu


def _rup(n, m):
    return ((n + m - 1) // m) * m


class Meta(NamedTuple):
    p: int
    s: int
    e: int
    l: int
    t: int
    a: int
    a_pad: int
    num_obs: int
    bias_off: Tuple[int, ...]      # 11 offsets (128-lane aligned) into packed bias row
    bias_w: Tuple[int, ...]        # 11 widths


# ---------------------------------------------------------------------------
# ELU: prefer expm1 (EUP) if the Mosaic lowering supports it, probed once.
# ---------------------------------------------------------------------------
_ELU_FN = None


def _elu_fn():
    global _ELU_FN
    if _ELU_FN is not None:
        return _ELU_FN

    def elu_expm1(x):  # PyTorch nn.ELU(alpha=1.0)
        return jnp.where(x > 0, x, jnp.expm1(jnp.minimum(x, 0.0)))

    def elu_exp(x):
        return jnp.where(x > 0, x, jnp.exp(jnp.minimum(x, 0.0)) - 1.0)

    def _probe(x_ref, o_ref):
        o_ref[...] = elu_expm1(x_ref[...])

    try:
        jax.block_until_ready(
            pl.pallas_call(_probe, out_shape=jax.ShapeDtypeStruct((8, 128), jnp.float32))(
                jnp.zeros((8, 128), jnp.float32)))
        _ELU_FN = elu_expm1
    except Exception:  # lowering lacks expm1 -> numerically-equivalent fallback
        _ELU_FN = elu_exp
    return _ELU_FN


# ---------------------------------------------------------------------------
# Pallas kernel (built per Meta; all offsets/widths are static closures)
# ---------------------------------------------------------------------------
def _make_kernel(meta: Meta, act_dtype):
    P, S, E, T = meta.p, meta.s, meta.e, meta.t
    TP = T * P
    o_scan, o_pe, o_hist = P, P + S, meta.num_obs - TP
    boff, bw = meta.bias_off, meta.bias_w
    elu = _elu_fn()

    def kernel(x_ref, ws1, ws2, ws3, wp, w1, w2, wlo,
               w1pr, w1sc, w1pe, w1hi, wa2, wa3, wa4, b_ref, o_ref):
        def mm(a, wref):
            w = wref[...]
            return jnp.dot(a.astype(w.dtype), w, preferred_element_type=jnp.float32)

        def bias(i):
            return b_ref[:, boff[i]:boff[i] + bw[i]]       # (1, n) broadcast over rows

        def act(x):                                        # carried activation dtype
            return x.astype(act_dtype)

        # static in-kernel slices of the raw obs tile (no wrapper repack)
        prop = x_ref[:, 0:P]
        scan = x_ref[:, o_scan:o_scan + S]
        pe = x_ref[:, o_pe:o_pe + E]
        hist = x_ref[:, o_hist:o_hist + TP]                # trailing num_hist*num_prop columns

        # --- scan encoder: Linear+ELU, Linear+ELU, Linear+Tanh ---
        z = act(elu(mm(scan, ws1) + bias(0)))
        z = act(elu(mm(z, ws2) + bias(1)))
        z_scan = act(jnp.tanh(mm(z, ws3) + bias(2)))

        # --- StateHistoryEncoder as 4 dense block-structured matmuls ---
        h = act(elu(mm(hist, wp) + bias(3)))               # per-step Linear(P,30) (block-diag)
        h = act(elu(mm(h, w1) + bias(4)))                  # Conv1d(30->20, k=4, s=2)
        h = act(elu(mm(h, w2) + bias(5)))                  # Conv1d(20->10, k=2, s=1)
        z_hist = act(elu(mm(h, wlo) + bias(6)))            # Flatten(perm) + Linear(30,20)

        # --- actor backbone (layer-1 concat expressed as 4 split matmuls) ---
        a = mm(prop, w1pr) + mm(z_scan, w1sc) + mm(pe, w1pe) + mm(z_hist, w1hi) + bias(7)
        a = act(elu(a))
        a = act(elu(mm(a, wa2) + bias(8)))
        a = act(elu(mm(a, wa3) + bias(9)))
        o_ref[...] = (mm(a, wa4) + bias(10)).astype(o_ref.dtype)   # lane-dense (bb, 128)

    return kernel


# ---------------------------------------------------------------------------
# One-time weight re-layout (hoisted out of the per-call path)
# ---------------------------------------------------------------------------
def precompute(params, *, P, S, E, L, T, A, ch=10, weight_dtype=jnp.float32):
    assert T == 10, "only tsteps=10 StateHistoryEncoder conv config implemented"
    # TODO(synk): tsteps=20/50 StateHistoryEncoder conv variants (same block-matrix folding,
    #             different kernel/stride sizes) not instantiated.
    f32 = np.float32
    g = lambda k: np.asarray(params[k], f32)
    c3, c2, c1 = 3 * ch, 2 * ch, ch
    L1, L2 = 4, 3                                          # conv output lengths for tsteps=10

    ws1, ws2, ws3 = g('ws1').T, g('ws2').T, g('ws3').T

    # per-step projection Linear(P, 3ch) as (T*P, T*3ch) block-diagonal
    wp = np.zeros((T * P, T * c3), f32)
    for tt in range(T):
        wp[tt * P:(tt + 1) * P, tt * c3:(tt + 1) * c3] = g('we').T

    # Conv1d(3ch->2ch, k=4, s=2) as (T*3ch, L1*2ch) block-sparse matrix
    wc1 = g('wc1')                                         # (2ch, 3ch, 4)
    w1 = np.zeros((T * c3, L1 * c2), f32)
    for ll in range(L1):
        for k in range(4):
            tt = 2 * ll + k
            w1[tt * c3:(tt + 1) * c3, ll * c2:(ll + 1) * c2] = wc1[:, :, k].T

    # Conv1d(2ch->ch, k=2, s=1) as (L1*2ch, L2*ch) block-sparse matrix
    wc2 = g('wc2')                                         # (ch, 2ch, 2)
    w2 = np.zeros((L1 * c2, L2 * c1), f32)
    for ll in range(L2):
        for k in range(2):
            w2[(ll + k) * c2:(ll + k + 1) * c2, ll * c1:(ll + 1) * c1] = wc2[:, :, k].T

    # torch Flatten is channel-major (c*L2+l); our layout is time-major (l*ch+c)
    perm = np.array([c * L2 + ll for ll in range(L2) for c in range(c1)])
    wlo = g('wlo').T[perm, :]                              # (L2*ch, 20)

    # backbone layer 1 split along concat [prop, scan_latent(32), priv_explicit, hist_latent(20)]
    wa1 = g('wa1')
    nzs = ws3.shape[1]                                     # scan-latent width (32)
    w1pr = wa1[:, :P].T
    w1sc = wa1[:, P:P + nzs].T
    w1pe = wa1[:, P + nzs:P + nzs + E].T
    w1hi = wa1[:, P + nzs + E:].T
    wa2, wa3 = g('wa2').T, g('wa3').T

    a_pad = _rup(A, 128)                                   # lane-dense output padding
    wa4 = np.zeros((g('wa4').shape[1], a_pad), f32)
    wa4[:, :A] = g('wa4').T

    # pack all 11 biases into one f32 row, each segment 128-lane aligned
    bias_vecs = [g('bs1'), g('bs2'), g('bs3'),
                 np.tile(g('be'), T), np.tile(g('bc1'), L1), np.tile(g('bc2'), L2), g('blo'),
                 g('ba1'), g('ba2'), g('ba3'), np.pad(g('ba4'), (0, a_pad - A))]
    boff, bw, cur = [], [], 0
    for v in bias_vecs:
        boff.append(cur)
        bw.append(v.shape[0])
        cur += _rup(v.shape[0], 128)
    bias = np.zeros((1, cur), f32)
    for o, v in zip(boff, bias_vecs):
        bias[0, o:o + v.shape[0]] = v

    meta = Meta(p=P, s=S, e=E, l=L, t=T, a=A, a_pad=a_pad,
                num_obs=P + S + E + L + T * P,
                bias_off=tuple(boff), bias_w=tuple(bw))

    weights = tuple(jnp.asarray(w, weight_dtype) for w in
                    (ws1, ws2, ws3, wp, w1, w2, wlo,
                     w1pr, w1sc, w1pe, w1hi, wa2, wa3, wa4))
    return meta, weights, jnp.asarray(bias)


# ---------------------------------------------------------------------------
# Wrappers
# ---------------------------------------------------------------------------
def _pick_tiles(B, desired):
    """Rows per grid step (multiple of 8) and padded batch.  For B >= 16 the batch is split
    into >= 2 roughly equal tiles so the 'parallel' axis keeps both v7x TensorCores busy;
    `desired` caps the tile (256 fills the 256-wide v6e/v7x MXU M dim)."""
    if B < 16:
        bb = max(8, _rup(B, 8))
        return bb, bb
    n = max(2, math.ceil(B / desired))
    bb = _rup(math.ceil(B / n), 8)
    return bb, n * bb


def make_batched_forward(prep, *, block_b=256, act_dtype=None):
    """Returns a jitted (B, num_obs) -> (B, num_actions) forward running one Pallas kernel.
    block_b = max batch rows per grid step.  act_dtype defaults to the weight dtype, so a
    bf16 `precompute` gives bf16 weights AND bf16 carried activations (f32 MXU accumulation).
    For v5e prefer act_dtype=jnp.float32 even with bf16 weights (no bf16 VPU there)."""
    meta, weights, bias = prep
    if act_dtype is None:
        act_dtype = weights[0].dtype
    kernel = _make_kernel(meta, act_dtype)
    weight_bytes = sum(int(np.prod(w.shape)) * w.dtype.itemsize for w in weights)
    weight_bytes += int(np.prod(bias.shape)) * bias.dtype.itemsize

    def fwd(obs_batch):
        if obs_batch.ndim != 2 or obs_batch.shape[1] != meta.num_obs:
            raise ValueError(f"expected (B, {meta.num_obs}) observations, got {obs_batch.shape}")
        obs = obs_batch if obs_batch.dtype == jnp.float32 else obs_batch.astype(jnp.float32)
        B = obs.shape[0]
        bb, bp = _pick_tiles(B, block_b)
        if bp != B:                                        # row pad only; columns untouched
            obs = jnp.pad(obs, ((0, bp - B), (0, 0)))

        # double-buffered in/out tiles + weights + intermediate-activation headroom
        vmem = 2 * weight_bytes + 2 * 4 * bb * (meta.num_obs + meta.a_pad) + 4 * bb * 2048
        vmem = int(min(max(vmem + (4 << 20), 32 << 20), 48 << 20))

        out = pl.pallas_call(
            kernel,
            out_shape=jax.ShapeDtypeStruct((bp, meta.a_pad), jnp.float32),
            grid=(bp // bb,),
            in_specs=[pl.BlockSpec((bb, meta.num_obs), lambda i: (i, 0))]
                     + [pl.BlockSpec(w.shape, lambda i: (0, 0)) for w in weights]
                     + [pl.BlockSpec(bias.shape, lambda i: (0, 0))],
            out_specs=pl.BlockSpec((bb, meta.a_pad), lambda i: (i, 0)),
            compiler_params=pltpu.CompilerParams(
                dimension_semantics=("parallel",),          # shard batch tiles across TCs (v7x)
                vmem_limit_bytes=vmem),
        )(obs, *weights, bias)
        return out[:B, :meta.a]

    return jax.jit(fwd)


def scandot_actor_forward(obs_flat, batched_fwd):
    """Module-equivalent forward: obs.reshape(1,-1) -> actor -> .squeeze()  =>  (A,)."""
    return batched_fwd(obs_flat.reshape(1, -1))[0]


# ---------------------------------------------------------------------------
# Parameter construction (PyTorch-convention shapes, deterministic init)
# ---------------------------------------------------------------------------
def _linear(key, fan_in, fan_out):
    kw, kb = jax.random.split(key)
    bound = 1.0 / math.sqrt(fan_in)
    w = jax.random.uniform(kw, (fan_out, fan_in), jnp.float32, -bound, bound)
    b = jax.random.uniform(kb, (fan_out,), jnp.float32, -bound, bound)
    return w, b


def _conv1d(key, cout, cin, ksz):
    kw, kb = jax.random.split(key)
    bound = 1.0 / math.sqrt(cin * ksz)
    w = jax.random.uniform(kw, (cout, cin, ksz), jnp.float32, -bound, bound)
    b = jax.random.uniform(kb, (cout,), jnp.float32, -bound, bound)
    return w, b


def init_params(key, P, S, E, T, A,
                scan_dims=(128, 64, 32), actor_dims=(512, 256, 128),
                priv_enc_out=20, ch=10):
    assert T == 10
    ks = jax.random.split(key, 12)
    p = {}
    p['ws1'], p['bs1'] = _linear(ks[0], S, scan_dims[0])
    p['ws2'], p['bs2'] = _linear(ks[1], scan_dims[0], scan_dims[1])
    p['ws3'], p['bs3'] = _linear(ks[2], scan_dims[1], scan_dims[2])
    p['we'],  p['be']  = _linear(ks[3], P, 3 * ch)
    p['wc1'], p['bc1'] = _conv1d(ks[4], 2 * ch, 3 * ch, 4)
    p['wc2'], p['bc2'] = _conv1d(ks[5], ch, 2 * ch, 2)
    p['wlo'], p['blo'] = _linear(ks[6], 3 * ch, priv_enc_out)
    in_dim = P + scan_dims[2] + E + priv_enc_out
    p['wa1'], p['ba1'] = _linear(ks[7], in_dim, actor_dims[0])
    p['wa2'], p['ba2'] = _linear(ks[8], actor_dims[0], actor_dims[1])
    p['wa3'], p['ba3'] = _linear(ks[9], actor_dims[1], actor_dims[2])
    p['wa4'], p['ba4'] = _linear(ks[10], actor_dims[2], A)
    return p


# ---------------------------------------------------------------------------
# Pure-JAX reference (mirrors the PyTorch module) for validation
# ---------------------------------------------------------------------------
def reference_forward(obs_flat, params, *, P, S, E, L, T, A):
    elu = lambda x: jnp.where(x > 0, x, jnp.exp(jnp.minimum(x, 0.0)) - 1.0)
    lin = lambda x, w, b: x @ w.T + b
    obs = obs_flat.reshape(1, -1)
    prop = obs[:, :P]
    scan = obs[:, P:P + S]
    pe = obs[:, P + S:P + S + E]
    hist = obs[:, -T * P:].reshape(T, P)

    s = elu(lin(scan, params['ws1'], params['bs1']))
    s = elu(lin(s, params['ws2'], params['bs2']))
    scan_latent = jnp.tanh(lin(s, params['ws3'], params['bs3']))

    proj = elu(lin(hist, params['we'], params['be']))      # (T, 30)
    x = proj.T[None]                                       # (1, 30, T)  NCL

    def conv1d(x, w, b, stride):
        y = lax.conv_general_dilated(x, w, (stride,), 'VALID',
                                     dimension_numbers=('NCH', 'OIH', 'NCH'))
        return y + b[None, :, None]

    y = elu(conv1d(x, params['wc1'], params['bc1'], 2))
    y = elu(conv1d(y, params['wc2'], params['bc2'], 1))
    flat = y.reshape(1, -1)                                # torch Flatten (channel-major)
    hist_latent = elu(lin(flat, params['wlo'], params['blo']))

    bb = jnp.concatenate([prop, scan_latent, pe, hist_latent], axis=1)
    h = elu(lin(bb, params['wa1'], params['ba1']))
    h = elu(lin(h, params['wa2'], params['ba2']))
    h = elu(lin(h, params['wa3'], params['ba3']))
    return lin(h, params['wa4'], params['ba4'])[0]


# ---------------------------------------------------------------------------
if __name__ == "__main__":
    # Small, module-consistent sizes (num_hist must be 10/20/50; we use 10).
    P, S, E, L, T, A = 16, 32, 4, 8, 10, 8     # prop, scan, priv_explicit, priv_latent, hist, actions
    num_obs = P + S + E + L + T * P            # 220

    key = jax.random.PRNGKey(0)
    k_obs, k_param, k_batch = jax.random.split(key, 3)
    params = init_params(k_param, P, S, E, T, A)

    # f32-weight path (tight correctness check)
    prep = precompute(params, P=P, S=S, E=E, L=L, T=T, A=A, weight_dtype=jnp.float32)
    fwd = make_batched_forward(prep)           # block_b=256 default; tile auto-picked per B

    # 1) single-obs path (exact module semantics: flat obs -> (A,))
    obs = jax.random.normal(k_obs, (num_obs,), jnp.float32)
    out1 = jax.block_until_ready(scandot_actor_forward(obs, fwd))
    ref1 = reference_forward(obs, params, P=P, S=S, E=E, L=L, T=T, A=A)
    np.testing.assert_allclose(np.asarray(out1), np.asarray(ref1), rtol=1e-3, atol=1e-3)
    assert out1.shape == (A,)

    # 2) batched path: B=300 -> 2 grid steps of 152 rows (row pad 300 -> 304)
    B = 300
    obs_b = jax.random.normal(k_batch, (B, num_obs), jnp.float32)
    out_b = jax.block_until_ready(fwd(obs_b))
    ref_b = jax.vmap(lambda o: reference_forward(o, params, P=P, S=S, E=E, L=L, T=T, A=A))(obs_b)
    np.testing.assert_allclose(np.asarray(out_b), np.asarray(ref_b), rtol=1e-3, atol=1e-3)
    assert out_b.shape == (B, A)

    # 3) bf16 path: bf16 weights + bf16 carried activations, f32 MXU accumulation
    prep_bf16 = precompute(params, P=P, S=S, E=E, L=L, T=T, A=A, weight_dtype=jnp.bfloat16)
    fwd_bf16 = make_batched_forward(prep_bf16)
    out_bf = jax.block_until_ready(fwd_bf16(obs_b))
    np.testing.assert_allclose(np.asarray(out_bf), np.asarray(ref_b), rtol=1e-1, atol=1e-1)

    print("KERNEL_OK")
</pallas_src>

<mosaic_0001>
module attributes {stable_mosaic.version = 11 : i64} {
  func.func @kernel(%arg0: i32, %arg1: memref<8x220xf32, #tpu.memory_space<vmem>>, %arg2: memref<32x128xf32, #tpu.memory_space<vmem>>, %arg3: memref<128x64xf32, #tpu.memory_space<vmem>>, %arg4: memref<64x32xf32, #tpu.memory_space<vmem>>, %arg5: memref<160x300xf32, #tpu.memory_space<vmem>>, %arg6: memref<300x80xf32, #tpu.memory_space<vmem>>, %arg7: memref<80x30xf32, #tpu.memory_space<vmem>>, %arg8: memref<30x20xf32, #tpu.memory_space<vmem>>, %arg9: memref<16x512xf32, #tpu.memory_space<vmem>>, %arg10: memref<32x512xf32, #tpu.memory_space<vmem>>, %arg11: memref<4x512xf32, #tpu.memory_space<vmem>>, %arg12: memref<20x512xf32, #tpu.memory_space<vmem>>, %arg13: memref<512x256xf32, #tpu.memory_space<vmem>>, %arg14: memref<256x128xf32, #tpu.memory_space<vmem>>, %arg15: memref<128x128xf32, #tpu.memory_space<vmem>>, %arg16: memref<1x2176xf32, #tpu.memory_space<vmem>>, %arg17: memref<8x128xf32, #tpu.memory_space<vmem>>) attributes {dimension_semantics = [#tpu.dimension_semantics<parallel>], iteration_bounds = array<i64: 1>, scalar_prefetch = 0 : i64, scratch_operands = 0 : i64, tpu.core_type = #tpu.core_type<tc>, window_params = [{transform_indices = @transform_0, window_bounds = array<i64: 8, 220>}, {pipeline_mode = #tpu.pipeline_mode<synchronous>, transform_indices = @transform_1, window_bounds = array<i64: 32, 128>}, {pipeline_mode = #tpu.pipeline_mode<synchronous>, transform_indices = @transform_2, window_bounds = array<i64: 128, 64>}, {pipeline_mode = #tpu.pipeline_mode<synchronous>, transform_indices = @transform_3, window_bounds = array<i64: 64, 32>}, {pipeline_mode = #tpu.pipeline_mode<synchronous>, transform_indices = @transform_4, window_bounds = array<i64: 160, 300>}, {pipeline_mode = #tpu.pipeline_mode<synchronous>, transform_indices = @transform_5, window_bounds = array<i64: 300, 80>}, {pipeline_mode = #tpu.pipeline_mode<synchronous>, transform_indices = @transform_6, window_bounds = array<i64: 80, 30>}, {pipeline_mode = #tpu.pipeline_mode<synchronous>, transform_indices = @transform_7, window_bounds = array<i64: 30, 20>}, {pipeline_mode = #tpu.pipeline_mode<synchronous>, transform_indices = @transform_8, window_bounds = array<i64: 16, 512>}, {pipeline_mode = #tpu.pipeline_mode<synchronous>, transform_indices = @transform_9, window_bounds = array<i64: 32, 512>}, {pipeline_mode = #tpu.pipeline_mode<synchronous>, transform_indices = @transform_10, window_bounds = array<i64: 4, 512>}, {pipeline_mode = #tpu.pipeline_mode<synchronous>, transform_indices = @transform_11, window_bounds = array<i64: 20, 512>}, {pipeline_mode = #tpu.pipeline_mode<synchronous>, transform_indices = @transform_12, window_bounds = array<i64: 512, 256>}, {pipeline_mode = #tpu.pipeline_mode<synchronous>, transform_indices = @transform_13, window_bounds = array<i64: 256, 128>}, {pipeline_mode = #tpu.pipeline_mode<synchronous>, transform_indices = @transform_14, window_bounds = array<i64: 128, 128>}, {pipeline_mode = #tpu.pipeline_mode<synchronous>, transform_indices = @transform_15, window_bounds = array<i64: 1, 2176>}, {transform_indices = @transform_16, window_bounds = array<i64: 8, 128>}]} {
    %c0 = arith.constant 0 : index
    %c0_0 = arith.constant 0 : index
    %0 = vector.load %arg1[%c0, %c0_0] : memref<8x220xf32, #tpu.memory_space<vmem>>, vector<8x16xf32>
    %c0_1 = arith.constant 0 : index
    %c16 = arith.constant 16 : index
    %1 = vector.load %arg1[%c0_1, %c16] : memref<8x220xf32, #tpu.memory_space<vmem>>, vector<8x32xf32>
    %c0_2 = arith.constant 0 : index
    %c48 = arith.constant 48 : index
    %2 = vector.load %arg1[%c0_2, %c48] : memref<8x220xf32, #tpu.memory_space<vmem>>, vector<8x4xf32>
    %c0_3 = arith.constant 0 : index
    %c60 = arith.constant 60 : index
    %3 = vector.load %arg1[%c0_3, %c60] : memref<8x220xf32, #tpu.memory_space<vmem>>, vector<8x160xf32>
    %c0_4 = arith.constant 0 : index
    %c0_5 = arith.constant 0 : index
    %4 = vector.load %arg2[%c0_4, %c0_5] : memref<32x128xf32, #tpu.memory_space<vmem>>, vector<32x128xf32>
    %cst = arith.constant dense<0.000000e+00> : vector<8x128xf32>
    %5 = tpu.matmul %1, %4, %cst {dimension_numbers = #tpu.dot_dimension_numbers<[1], [0], [0], [1], [0, 0, 1, 1], [], []>} : vector<8x32xf32>, vector<32x128xf32>, vector<8x128xf32> -> vector<8x128xf32>
    %c0_6 = arith.constant 0 : index
    %c0_7 = arith.constant 0 : index
    %6 = vector.load %arg16[%c0_6, %c0_7] : memref<1x2176xf32, #tpu.memory_space<vmem>>, vector<1x128xf32>
    %7 = vector.broadcast %6 : vector<1x128xf32> to vector<8x128xf32>
    %8 = arith.addf %5, %7 : vector<8x128xf32>
    %cst_8 = arith.constant 0.000000e+00 : f32
    %9 = vector.broadcast %cst_8 : f32 to vector<8x128xf32>
    %10 = arith.cmpf ogt, %8, %9 : vector<8x128xf32>
    %cst_9 = arith.constant 0.000000e+00 : f32
    %11 = vector.broadcast %cst_9 : f32 to vector<8x128xf32>
    %12 = arith.minimumf %8, %11 : vector<8x128xf32>
    %13 = math.exp %12 : vector<8x128xf32>
    %cst_10 = arith.constant 1.000000e+00 : f32
    %14 = vector.broadcast %cst_10 : f32 to vector<8x128xf32>
    %15 = arith.subf %13, %14 : vector<8x128xf32>
    %16 = arith.select %10, %8, %15 : vector<8x128xi1>, vector<8x128xf32>
    %c0_11 = arith.constant 0 : index
    %c0_12 = arith.constant 0 : index
    %17 = vector.load %arg3[%c0_11, %c0_12] : memref<128x64xf32, #tpu.memory_space<vmem>>, vector<128x64xf32>
    %cst_13 = arith.constant dense<0.000000e+00> : vector<8x64xf32>
    %18 = tpu.matmul %16, %17, %cst_13 {dimension_numbers = #tpu.dot_dimension_numbers<[1], [0], [0], [1], [0, 0, 1, 1], [], []>} : vector<8x128xf32>, vector<128x64xf32>, vector<8x64xf32> -> vector<8x64xf32>
    %c0_14 = arith.constant 0 : index
    %c128 = arith.constant 128 : index
    %19 = vector.load %arg16[%c0_14, %c128] : memref<1x2176xf32, #tpu.memory_space<vmem>>, vector<1x64xf32>
    %20 = vector.broadcast %19 : vector<1x64xf32> to vector<8x64xf32>
    %21 = arith.addf %18, %20 : vector<8x64xf32>
    %cst_15 = arith.constant 0.000000e+00 : f32
    %22 = vector.broadcast %cst_15 : f32 to vector<8x64xf32>
    %23 = arith.cmpf ogt, %21, %22 : vector<8x64xf32>
    %cst_16 = arith.constant 0.000000e+00 : f32
    %24 = vector.broadcast %cst_16 : f32 to vector<8x64xf32>
    %25 = arith.minimumf %21, %24 : vector<8x64xf32>
    %26 = math.exp %25 : vector<8x64xf32>
    %cst_17 = arith.constant 1.000000e+00 : f32
    %27 = vector.broadcast %cst_17 : f32 to vector<8x64xf32>
    %28 = arith.subf %26, %27 : vector<8x64xf32>
    %29 = arith.select %23, %21, %28 : vector<8x64xi1>, vector<8x64xf32>
    %c0_18 = arith.constant 0 : index
    %c0_19 = arith.constant 0 : index
    %30 = vector.load %arg4[%c0_18, %c0_19] : memref<64x32xf32, #tpu.memory_space<vmem>>, vector<64x32xf32>
    %cst_20 = arith.constant dense<0.000000e+00> : vector<8x32xf32>
    %31 = tpu.matmul %29, %30, %cst_20 {dimension_numbers = #tpu.dot_dimension_numbers<[1], [0], [0], [1], [0, 0, 1, 1], [], []>} : vector<8x64xf32>, vector<64x32xf32>, vector<8x32xf32> -> vector<8x32xf32>
    %c0_21 = arith.constant 0 : index
    %c256 = arith.constant 256 : index
    %32 = vector.load %arg16[%c0_21, %c256] : memref<1x2176xf32, #tpu.memory_space<vmem>>, vector<1x32xf32>
    %33 = vector.broadcast %32 : vector<1x32xf32> to vector<8x32xf32>
    %34 = arith.addf %31, %33 : vector<8x32xf32>
    %35 = math.tanh %34 : vector<8x32xf32>
    %c0_22 = arith.constant 0 : index
    %c0_23 = arith.constant 0 : index
    %36 = vector.load %arg5[%c0_22, %c0_23] : memref<160x300xf32, #tpu.memory_space<vmem>>, vector<160x300xf32>
    %cst_24 = arith.constant dense<0.000000e+00> : vector<8x300xf32>
    %37 = tpu.matmul %3, %36, %cst_24 {dimension_numbers = #tpu.dot_dimension_numbers<[1], [0], [0], [1], [0, 0, 1, 1], [], []>} : vector<8x160xf32>, vector<160x300xf32>, vector<8x300xf32> -> vector<8x300xf32>
    %c0_25 = arith.constant 0 : index
    %c384 = arith.constant 384 : index
    %38 = vector.load %arg16[%c0_25, %c384] : memref<1x2176xf32, #tpu.memory_space<vmem>>, vector<1x300xf32>
    %39 = vector.broadcast %38 : vector<1x300xf32> to vector<8x300xf32>
    %40 = arith.addf %37, %39 : vector<8x300xf32>
    %cst_26 = arith.constant 0.000000e+00 : f32
    %41 = vector.broadcast %cst_26 : f32 to vector<8x300xf32>
    %42 = arith.cmpf ogt, %40, %41 : vector<8x300xf32>
    %cst_27 = arith.constant 0.000000e+00 : f32
    %43 = vector.broadcast %cst_27 : f32 to vector<8x300xf32>
    %44 = arith.minimumf %40, %43 : vector<8x300xf32>
    %45 = math.exp %44 : vector<8x300xf32>
    %cst_28 = arith.constant 1.000000e+00 : f32
    %46 = vector.broadcast %cst_28 : f32 to vector<8x300xf32>
    %47 = arith.subf %45, %46 : vector<8x300xf32>
    %48 = arith.select %42, %40, %47 : vector<8x300xi1>, vector<8x300xf32>
    %c0_29 = arith.constant 0 : index
    %c0_30 = arith.constant 0 : index
    %49 = vector.load %arg6[%c0_29, %c0_30] : memref<300x80xf32, #tpu.memory_space<vmem>>, vector<300x80xf32>
    %cst_31 = arith.constant dense<0.000000e+00> : vector<8x80xf32>
    %50 = tpu.matmul %48, %49, %cst_31 {dimension_numbers = #tpu.dot_dimension_numbers<[1], [0], [0], [1], [0, 0, 1, 1], [], []>} : vector<8x300xf32>, vector<300x80xf32>, vector<8x80xf32> -> vector<8x80xf32>
    %c0_32 = arith.constant 0 : index
    %c768 = arith.constant 768 : index
    %51 = vector.load %arg16[%c0_32, %c768] : memref<1x2176xf32, #tpu.memory_space<vmem>>, vector<1x80xf32>
    %52 = vector.broadcast %51 : vector<1x80xf32> to vector<8x80xf32>
    %53 = arith.addf %50, %52 : vector<8x80xf32>
    %cst_33 = arith.constant 0.000000e+00 : f32
    %54 = vector.broadcast %cst_33 : f32 to vector<8x80xf32>
    %55 = arith.cmpf ogt, %53, %54 : vector<8x80xf32>
    %cst_34 = arith.constant 0.000000e+00 : f32
    %56 = vector.broadcast %cst_34 : f32 to vector<8x80xf32>
    %57 = arith.minimumf %53, %56 : vector<8x80xf32>
    %58 = math.exp %57 : vector<8x80xf32>
    %cst_35 = arith.constant 1.000000e+00 : f32
    %59 = vector.broadcast %cst_35 : f32 to vector<8x80xf32>
    %60 = arith.subf %58, %59 : vector<8x80xf32>
    %61 = arith.select %55, %53, %60 : vector<8x80xi1>, vector<8x80xf32>
    %c0_36 = arith.constant 0 : index
    %c0_37 = arith.constant 0 : index
    %62 = vector.load %arg7[%c0_36, %c0_37] : memref<80x30xf32, #tpu.memory_space<vmem>>, vector<80x30xf32>
    %cst_38 = arith.constant dense<0.000000e+00> : vector<8x30xf32>
    %63 = tpu.matmul %61, %62, %cst_38 {dimension_numbers = #tpu.dot_dimension_numbers<[1], [0], [0], [1], [0, 0, 1, 1], [], []>} : vector<8x80xf32>, vector<80x30xf32>, vector<8x30xf32> -> vector<8x30xf32>
    %c0_39 = arith.constant 0 : index
    %c896 = arith.constant 896 : index
    %64 = vector.load %arg16[%c0_39, %c896] : memref<1x2176xf32, #tpu.memory_space<vmem>>, vector<1x30xf32>
    %65 = vector.broadcast %64 : vector<1x30xf32> to vector<8x30xf32>
    %66 = arith.addf %63, %65 : vector<8x30xf32>
    %cst_40 = arith.constant 0.000000e+00 : f32
    %67 = vector.broadcast %cst_40 : f32 to vector<8x30xf32>
    %68 = arith.cmpf ogt, %66, %67 : vector<8x30xf32>
    %cst_41 = arith.constant 0.000000e+00 : f32
    %69 = vector.broadcast %cst_41 : f32 to vector<8x30xf32>
    %70 = arith.minimumf %66, %69 : vector<8x30xf32>
    %71 = math.exp %70 : vector<8x30xf32>
    %cst_42 = arith.constant 1.000000e+00 : f32
    %72 = vector.broadcast %cst_42 : f32 to vector<8x30xf32>
    %73 = arith.subf %71, %72 : vector<8x30xf32>
    %74 = arith.select %68, %66, %73 : vector<8x30xi1>, vector<8x30xf32>
    %c0_43 = arith.constant 0 : index
    %c0_44 = arith.constant 0 : index
    %75 = vector.load %arg8[%c0_43, %c0_44] : memref<30x20xf32, #tpu.memory_space<vmem>>, vector<30x20xf32>
    %cst_45 = arith.constant dense<0.000000e+00> : vector<8x20xf32>
    %76 = tpu.matmul %74, %75, %cst_45 {dimension_numbers = #tpu.dot_dimension_numbers<[1], [0], [0], [1], [0, 0, 1, 1], [], []>} : vector<8x30xf32>, vector<30x20xf32>, vector<8x20xf32> -> vector<8x20xf32>
    %c0_46 = arith.constant 0 : index
    %c1024 = arith.constant 1024 : index
    %77 = vector.load %arg16[%c0_46, %c1024] : memref<1x2176xf32, #tpu.memory_space<vmem>>, vector<1x20xf32>
    %78 = vector.broadcast %77 : vector<1x20xf32> to vector<8x20xf32>
    %79 = arith.addf %76, %78 : vector<8x20xf32>
    %cst_47 = arith.constant 0.000000e+00 : f32
    %80 = vector.broadcast %cst_47 : f32 to vector<8x20xf32>
    %81 = arith.cmpf ogt, %79, %80 : vector<8x20xf32>
    %cst_48 = arith.constant 0.000000e+00 : f32
    %82 = vector.broadcast %cst_48 : f32 to vector<8x20xf32>
    %83 = arith.minimumf %79, %82 : vector<8x20xf32>
    %84 = math.exp %83 : vector<8x20xf32>
    %cst_49 = arith.constant 1.000000e+00 : f32
    %85 = vector.broadcast %cst_49 : f32 to vector<8x20xf32>
    %86 = arith.subf %84, %85 : vector<8x20xf32>
    %87 = arith.select %81, %79, %86 : vector<8x20xi1>, vector<8x20xf32>
    %c0_50 = arith.constant 0 : index
    %c0_51 = arith.constant 0 : index
    %88 = vector.load %arg9[%c0_50, %c0_51] : memref<16x512xf32, #tpu.memory_space<vmem>>, vector<16x512xf32>
    %cst_52 = arith.constant dense<0.000000e+00> : vector<8x512xf32>
    %89 = tpu.matmul %0, %88, %cst_52 {dimension_numbers = #tpu.dot_dimension_numbers<[1], [0], [0], [1], [0, 0, 1, 1], [], []>} : vector<8x16xf32>, vector<16x512xf32>, vector<8x512xf32> -> vector<8x512xf32>
    %c0_53 = arith.constant 0 : index
    %c0_54 = arith.constant 0 : index
    %90 = vector.load %arg10[%c0_53, %c0_54] : memref<32x512xf32, #tpu.memory_space<vmem>>, vector<32x512xf32>
    %cst_55 = arith.constant dense<0.000000e+00> : vector<8x512xf32>
    %91 = tpu.matmul %35, %90, %cst_55 {dimension_numbers = #tpu.dot_dimension_numbers<[1], [0], [0], [1], [0, 0, 1, 1], [], []>} : vector<8x32xf32>, vector<32x512xf32>, vector<8x512xf32> -> vector<8x512xf32>
    %92 = arith.addf %89, %91 : vector<8x512xf32>
    %c0_56 = arith.constant 0 : index
    %c0_57 = arith.constant 0 : index
    %93 = vector.load %arg11[%c0_56, %c0_57] : memref<4x512xf32, #tpu.memory_space<vmem>>, vector<4x512xf32>
    %cst_58 = arith.constant dense<0.000000e+00> : vector<8x512xf32>
    %94 = tpu.matmul %2, %93, %cst_58 {dimension_numbers = #tpu.dot_dimension_numbers<[1], [0], [0], [1], [0, 0, 1, 1], [], []>} : vector<8x4xf32>, vector<4x512xf32>, vector<8x512xf32> -> vector<8x512xf32>
    %95 = arith.addf %92, %94 : vector<8x512xf32>
    %c0_59 = arith.constant 0 : index
    %c0_60 = arith.constant 0 : index
    %96 = vector.load %arg12[%c0_59, %c0_60] : memref<20x512xf32, #tpu.memory_space<vmem>>, vector<20x512xf32>
    %cst_61 = arith.constant dense<0.000000e+00> : vector<8x512xf32>
    %97 = tpu.matmul %87, %96, %cst_61 {dimension_numbers = #tpu.dot_dimension_numbers<[1], [0], [0], [1], [0, 0, 1, 1], [], []>} : vector<8x20xf32>, vector<20x512xf32>, vector<8x512xf32> -> vector<8x512xf32>
    %98 = arith.addf %95, %97 : vector<8x512xf32>
    %c0_62 = arith.constant 0 : index
    %c1152 = arith.constant 1152 : index
    %99 = vector.load %arg16[%c0_62, %c1152] : memref<1x2176xf32, #tpu.memory_space<vmem>>, vector<1x512xf32>
    %100 = vector.broadcast %99 : vector<1x512xf32> to vector<8x512xf32>
    %101 = arith.addf %98, %100 : vector<8x512xf32>
    %cst_63 = arith.constant 0.000000e+00 : f32
    %102 = vector.broadcast %cst_63 : f32 to vector<8x512xf32>
    %103 = arith.cmpf ogt, %101, %102 : vector<8x512xf32>
    %cst_64 = arith.constant 0.000000e+00 : f32
    %104 = vector.broadcast %cst_64 : f32 to vector<8x512xf32>
    %105 = arith.minimumf %101, %104 : vector<8x512xf32>
    %106 = math.exp %105 : vector<8x512xf32>
    %cst_65 = arith.constant 1.000000e+00 : f32
    %107 = vector.broadcast %cst_65 : f32 to vector<8x512xf32>
    %108 = arith.subf %106, %107 : vector<8x512xf32>
    %109 = arith.select %103, %101, %108 : vector<8x512xi1>, vector<8x512xf32>
    %c0_66 = arith.constant 0 : index
    %c0_67 = arith.constant 0 : index
    %110 = vector.load %arg13[%c0_66, %c0_67] : memref<512x256xf32, #tpu.memory_space<vmem>>, vector<512x256xf32>
    %cst_68 = arith.constant dense<0.000000e+00> : vector<8x256xf32>
    %111 = tpu.matmul %109, %110, %cst_68 {dimension_numbers = #tpu.dot_dimension_numbers<[1], [0], [0], [1], [0, 0, 1, 1], [], []>} : vector<8x512xf32>, vector<512x256xf32>, vector<8x256xf32> -> vector<8x256xf32>
    %c0_69 = arith.constant 0 : index
    %c1664 = arith.constant 1664 : index
    %112 = vector.load %arg16[%c0_69, %c1664] : memref<1x2176xf32, #tpu.memory_space<vmem>>, vector<1x256xf32>
    %113 = vector.broadcast %112 : vector<1x256xf32> to vector<8x256xf32>
    %114 = arith.addf %111, %113 : vector<8x256xf32>
    %cst_70 = arith.constant 0.000000e+00 : f32
    %115 = vector.broadcast %cst_70 : f32 to vector<8x256xf32>
    %116 = arith.cmpf ogt, %114, %115 : vector<8x256xf32>
    %cst_71 = arith.constant 0.000000e+00 : f32
    %117 = vector.broadcast %cst_71 : f32 to vector<8x256xf32>
    %118 = arith.minimumf %114, %117 : vector<8x256xf32>
    %119 = math.exp %118 : vector<8x256xf32>
    %cst_72 = arith.constant 1.000000e+00 : f32
    %120 = vector.broadcast %cst_72 : f32 to vector<8x256xf32>
    %121 = arith.subf %119, %120 : vector<8x256xf32>
    %122 = arith.select %116, %114, %121 : vector<8x256xi1>, vector<8x256xf32>
    %c0_73 = arith.constant 0 : index
    %c0_74 = arith.constant 0 : index
    %123 = vector.load %arg14[%c0_73, %c0_74] : memref<256x128xf32, #tpu.memory_space<vmem>>, vector<256x128xf32>
    %cst_75 = arith.constant dense<0.000000e+00> : vector<8x128xf32>
    %124 = tpu.matmul %122, %123, %cst_75 {dimension_numbers = #tpu.dot_dimension_numbers<[1], [0], [0], [1], [0, 0, 1, 1], [], []>} : vector<8x256xf32>, vector<256x128xf32>, vector<8x128xf32> -> vector<8x128xf32>
    %c0_76 = arith.constant 0 : index
    %c1920 = arith.constant 1920 : index
    %125 = vector.load %arg16[%c0_76, %c1920] : memref<1x2176xf32, #tpu.memory_space<vmem>>, vector<1x128xf32>
    %126 = vector.broadcast %125 : vector<1x128xf32> to vector<8x128xf32>
    %127 = arith.addf %124, %126 : vector<8x128xf32>
    %cst_77 = arith.constant 0.000000e+00 : f32
    %128 = vector.broadcast %cst_77 : f32 to vector<8x128xf32>
    %129 = arith.cmpf ogt, %127, %128 : vector<8x128xf32>
    %cst_78 = arith.constant 0.000000e+00 : f32
    %130 = vector.broadcast %cst_78 : f32 to vector<8x128xf32>
    %131 = arith.minimumf %127, %130 : vector<8x128xf32>
    %132 = math.exp %131 : vector<8x128xf32>
    %cst_79 = arith.constant 1.000000e+00 : f32
    %133 = vector.broadcast %cst_79 : f32 to vector<8x128xf32>
    %134 = arith.subf %132, %133 : vector<8x128xf32>
    %135 = arith.select %129, %127, %134 : vector<8x128xi1>, vector<8x128xf32>
    %c0_80 = arith.constant 0 : index
    %c0_81 = arith.constant 0 : index
    %136 = vector.load %arg15[%c0_80, %c0_81] : memref<128x128xf32, #tpu.memory_space<vmem>>, vector<128x128xf32>
    %cst_82 = arith.constant dense<0.000000e+00> : vector<8x128xf32>
    %137 = tpu.matmul %135, %136, %cst_82 {dimension_numbers = #tpu.dot_dimension_numbers<[1], [0], [0], [1], [0, 0, 1, 1], [], []>} : vector<8x128xf32>, vector<128x128xf32>, vector<8x128xf32> -> vector<8x128xf32>
    %c0_83 = arith.constant 0 : index
    %c2048 = arith.constant 2048 : index
    %138 = vector.load %arg16[%c0_83, %c2048] : memref<1x2176xf32, #tpu.memory_space<vmem>>, vector<1x128xf32>
    %139 = vector.broadcast %138 : vector<1x128xf32> to vector<8x128xf32>
    %140 = arith.addf %137, %139 : vector<8x128xf32>
    %c0_84 = arith.constant 0 : index
    %c0_85 = arith.constant 0 : index
    %141 = vector.load %arg17[%c0_84, %c0_85] : memref<8x128xf32, #tpu.memory_space<vmem>>, vector<8x128xf32>
    tpu.vector_store %arg17[%c0_84, %c0_85], %140 {strides = array<i32>} : memref<8x128xf32, #tpu.memory_space<vmem>>, vector<8x128xf32>,
    return
  }
  func.func @transform_0(%arg0: i32) -> (i32, i32) {
    %c0_i32 = arith.constant 0 : i32
    %c0_i32_0 = arith.constant 0 : i32
    return %arg0, %c0_i32 : i32, i32
  }
  func.func @transform_1(%arg0: i32) -> (i32, i32) {
    %c0_i32 = arith.constant 0 : i32
    %c0_i32_0 = arith.constant 0 : i32
    %c0_i32_1 = arith.constant 0 : i32
    return %c0_i32, %c0_i32_0 : i32, i32
  }
  func.func @transform_2(%arg0: i32) -> (i32, i32) {
    %c0_i32 = arith.constant 0 : i32
    %c0_i32_0 = arith.constant 0 : i32
    %c0_i32_1 = arith.constant 0 : i32
    return %c0_i32, %c0_i32_0 : i32, i32
  }
  func.func @transform_3(%arg0: i32) -> (i32, i32) {
    %c0_i32 = arith.constant 0 : i32
    %c0_i32_0 = arith.constant 0 : i32
    %c0_i32_1 = arith.constant 0 : i32
    return %c0_i32, %c0_i32_0 : i32, i32
  }
  func.func @transform_4(%arg0: i32) -> (i32, i32) {
    %c0_i32 = arith.constant 0 : i32
    %c0_i32_0 = arith.constant 0 : i32
    %c0_i32_1 = arith.constant 0 : i32
    return %c0_i32, %c0_i32_0 : i32, i32
  }
  func.func @transform_5(%arg0: i32) -> (i32, i32) {
    %c0_i32 = arith.constant 0 : i32
    %c0_i32_0 = arith.constant 0 : i32
    %c0_i32_1 = arith.constant 0 : i32
    return %c0_i32, %c0_i32_0 : i32, i32
  }
  func.func @transform_6(%arg0: i32) -> (i32, i32) {
    %c0_i32 = arith.constant 0 : i32
    %c0_i32_0 = arith.constant 0 : i32
    %c0_i32_1 = arith.constant 0 : i32
    return %c0_i32, %c0_i32_0 : i32, i32
  }
  func.func @transform_7(%arg0: i32) -> (i32, i32) {
    %c0_i32 = arith.constant 0 : i32
    %c0_i32_0 = arith.constant 0 : i32
    %c0_i32_1 = arith.constant 0 : i32
    return %c0_i32, %c0_i32_0 : i32, i32
  }
  func.func @transform_8(%arg0: i32) -> (i32, i32) {
    %c0_i32 = arith.constant 0 : i32
    %c0_i32_0 = arith.constant 0 : i32
    %c0_i32_1 = arith.constant 0 : i32
    return %c0_i32, %c0_i32_0 : i32, i32
  }
  func.func @transform_9(%arg0: i32) -> (i32, i32) {
    %c0_i32 = arith.constant 0 : i32
    %c0_i32_0 = arith.constant 0 : i32
    %c0_i32_1 = arith.constant 0 : i32
    return %c0_i32, %c0_i32_0 : i32, i32
  }
  func.func @transform_10(%arg0: i32) -> (i32, i32) {
    %c0_i32 = arith.constant 0 : i32
    %c0_i32_0 = arith.constant 0 : i32
    %c0_i32_1 = arith.constant 0 : i32
    return %c0_i32, %c0_i32_0 : i32, i32
  }
  func.func @transform_11(%arg0: i32) -> (i32, i32) {
    %c0_i32 = arith.constant 0 : i32
    %c0_i32_0 = arith.constant 0 : i32
    %c0_i32_1 = arith.constant 0 : i32
    return %c0_i32, %c0_i32_0 : i32, i32
  }
  func.func @transform_12(%arg0: i32) -> (i32, i32) {
    %c0_i32 = arith.constant 0 : i32
    %c0_i32_0 = arith.constant 0 : i32
    %c0_i32_1 = arith.constant 0 : i32
    return %c0_i32, %c0_i32_0 : i32, i32
  }
  func.func @transform_13(%arg0: i32) -> (i32, i32) {
    %c0_i32 = arith.constant 0 : i32
    %c0_i32_0 = arith.constant 0 : i32
    %c0_i32_1 = arith.constant 0 : i32
    return %c0_i32, %c0_i32_0 : i32, i32
  }
  func.func @transform_14(%arg0: i32) -> (i32, i32) {
    %c0_i32 = arith.constant 0 : i32
    %c0_i32_0 = arith.constant 0 : i32
    %c0_i32_1 = arith.constant 0 : i32
    return %c0_i32, %c0_i32_0 : i32, i32
  }
  func.func @transform_15(%arg0: i32) -> (i32, i32) {
    %c0_i32 = arith.constant 0 : i32
    %c0_i32_0 = arith.constant 0 : i32
    %c0_i32_1 = arith.constant 0 : i32
    return %c0_i32, %c0_i32_0 : i32, i32
  }
  func.func @transform_16(%arg0: i32) -> (i32, i32) {
    %c0_i32 = arith.constant 0 : i32
    %c0_i32_0 = arith.constant 0 : i32
    return %arg0, %c0_i32 : i32, i32
  }
}

</mosaic_0001>

<bundles_post_ra>
// kernel: fwd.1
= control target key start
LH: loop header
LB: loop body
LE: loop exit
PB: predicated region body
PF: predicated region fallthrough
CT: control target
= control target key end

     0   :  { %s3952_s0 = inlined_call_operand.vmem [shape: f32[8,220], index: 0, kind: input, shape index: {}]   ;;  %s3953_s1 = inlined_call_operand.hbm [shape: f32[32,128], index: 1, kind: input, shape index: {}]   ;;  %s3954_s2 = inlined_call_operand.hbm [shape: f32[128,64], index: 2, kind: input, shape index: {}]   ;;  %s3955_s3 = inlined_call_operand.hbm [shape: f32[64,32], index: 3, kind: input, shape index: {}]   ;;  %s3956_s4 = inlined_call_operand.hbm [shape: f32[160,300], index: 4, kind: input, shape index: {}]   ;;  %s3957_s5 = inlined_call_operand.hbm [shape: f32[300,80], index: 5, kind: input, shape index: {}]   ;;  %s3958_s6 = inlined_call_operand.hbm [shape: f32[80,30], index: 6, kind: input, shape index: {}]   ;;  %s3959_s7 = inlined_call_operand.vmem [shape: f32[30,20], index: 7, kind: input, shape index: {}]   ;;  %s3960_s8 = inlined_call_operand.hbm [shape: f32[16,512], index: 8, kind: input, shape index: {}]   ;;  %s3961_s9 = inlined_call_operand.hbm [shape: f32[32,512], index: 9, kind: input, shape index: {}]   ;;  %s3962_s10 = inlined_call_operand.hbm [shape: f32[4,512], index: 10, kind: input, shape index: {}]   ;;  %s3963_s11 = inlined_call_operand.hbm [shape: f32[20,512], index: 11, kind: input, shape index: {}]   ;;  %s3964_s12 = inlined_call_operand.hbm [shape: f32[512,256], index: 12, kind: input, shape index: {}]   ;;  %s3965_s13 = inlined_call_operand.hbm [shape: f32[256,128], index: 13, kind: input, shape index: {}]   ;;  %s3966_s14 = inlined_call_operand.hbm [shape: f32[128,128], index: 14, kind: input, shape index: {}]   ;;  %s3967_s15 = inlined_call_operand.vmem [shape: f32[1,2176], index: 15, kind: input, shape index: {}]   ;;  %s3968_s16 = inlined_call_operand.vmem [shape: f32[8,128], index: 16, kind: output, shape index: {}]  }
   0x1   :  { %3972 = sst [smem:[#allocation29_spill]] %s3952_s0 }
   0x2   :  { %21 = vsyncpa [#allocation3], 0 }
   0x3   :  { %22 = vsyncpa [#allocation5], 0 }
   0x4   :  { %23 = vsyncpa [#allocation8], 0 }
   0x5   :  { %24 = vsyncpa [#allocation11], 0 }
   0x6   :  { %25 = vsyncpa [#allocation14], 0 }
   0x7   :  { %26 = vsyncpa [#allocation17], 0 }
   0x8   :  { %27 = vsyncpa [#allocation20], 0  ;;  %s3473_s21 = smov [#allocation4]   ;;  %s3474_s23 = smov [#allocation7]  }
   0x9   :  { %s47_s22 = sshll.u32 %s3473_s21, 4  ;;  %s71_s24 = sshll.u32 %s3474_s23, 4  ;;  %s48_s22 = int_to_ptr.vmem [resolvable:$true] %s47_s22  ;;  %s3586_s24 = int_to_ptr.vmem [resolvable:$true] %s71_s24 }
   0xa   :  { %s3173_s27 = scalar_lea.hbm %s3954_s2, 2048 }
   0xb   :  { %p3174_p0 = scmp.ne.s32.totalorder %s3954_s2, %s3173_s27  ;;  %p3177_p1 = scmp.lt.u32.totalorder %s3173_s27, %s3954_s2 }
   0xd   :  { %p3179_p2 = pnand %p3177_p1, %p3174_p0 }
   0xf   :  { %3182 = shalt.err (!%p3179_p2)
}
  0x10   :  { %s3183_s17 = scalar_lea.vmem %s48_s22, 2048  ;;  %p3188_p4 = scmp.lt.s32.totalorder %s48_s22, %s48_s22 }
  0x11   :  { %p3184_p3 = scmp.ne.s32.totalorder %s48_s22, %s3183_s17  ;;  %p3189_p5 = scmp.lt.s32.totalorder %s3183_s17, %s3183_s17 }
  0x13   :  { %p3190_p6 = por %p3189_p5, %p3188_p4 }
  0x15   :  { %p3191_p7 = pnand %p3190_p6, %p3184_p3 }
  0x17   :  { %3194 = shalt.err (!%p3191_p7)
}
  0x18   :  { %s3970_s18 = smov 128   ;;  %s3476_s19 = smov 8  }
  0x19   :  { %53 = dma.hbm_to_vmem [thread:$0]  %s3954_s2, 2048, %s48_s22, [#allocation5], %s3970_s18, %s3970_s18, %s3476_s19  }
  0x1a   :  { %s3195_s26 = scalar_lea.hbm %s3956_s4, 7680 }
  0x1b   :  { %p3196_p8 = scmp.ne.s32.totalorder %s3956_s4, %s3195_s26  ;;  %p3199_p9 = scmp.lt.u32.totalorder %s3195_s26, %s3956_s4 }
  0x1d   :  { %p3201_p10 = pnand %p3199_p9, %p3196_p8 }
  0x1f   :  { %3204 = shalt.err (!%p3201_p10)
}
  0x20   :  { %s3205_s0 = scalar_lea.vmem %s3586_s24, 7680  ;;  %p3210_p12 = scmp.lt.s32.totalorder %s3586_s24, %s3586_s24 }
  0x21   :  { %p3206_p11 = scmp.ne.s32.totalorder %s3586_s24, %s3205_s0  ;;  %p3211_p13 = scmp.lt.s32.totalorder %s3205_s0, %s3205_s0 }
  0x23   :  { %p3212_p0 = por %p3211_p13, %p3210_p12 }
  0x25   :  { %p3213_p1 = pnand %p3212_p0, %p3206_p11 }
  0x27   :  { %3216 = shalt.err (!%p3213_p1)
}
  0x28   :  { %s3477_s2 = smov 384   ;;  %s3478_s22 = smov 24  }
  0x29   :  { %77 = dma.hbm_to_vmem [thread:$0]  %s3956_s4, 7680, %s3586_s24, [#allocation8], %s3477_s2, %s3477_s2, %s3478_s22  }
  0x2a   :  { %s3479_s21 = smov [#allocation10]   ;;  %s3217_s27 = scalar_lea.hbm %s3958_s6, 1280 }
  0x2b   :  { %s95_s23 = sshll.u32 %s3479_s21, 4  ;;  %p3218_p2 = scmp.ne.s32.totalorder %s3958_s6, %s3217_s27  ;;  %s96_s23 = int_to_ptr.vmem [resolvable:$true] %s95_s23 }
  0x2c   :  { %p3221_p3 = scmp.lt.u32.totalorder %s3217_s27, %s3958_s6 }
  0x2e   :  { %p3223_p4 = pnand %p3221_p3, %p3218_p2 }
  0x30   :  { %3226 = shalt.err (!%p3223_p4)
}
  0x31   :  { %s3227_s18 = scalar_lea.vmem %s96_s23, 1280  ;;  %p3232_p6 = scmp.lt.s32.totalorder %s96_s23, %s96_s23 }
  0x32   :  { %p3228_p5 = scmp.ne.s32.totalorder %s96_s23, %s3227_s18  ;;  %p3233_p7 = scmp.lt.s32.totalorder %s3227_s18, %s3227_s18 }
  0x34   :  { %p3234_p8 = por %p3233_p7, %p3232_p6 }
  0x36   :  { %p3235_p9 = pnand %p3234_p8, %p3228_p5 }
  0x38   :  { %3238 = shalt.err (!%p3235_p9)
}
  0x39   :  { %s3973_s4 = smov 128   ;;  %s3480_s22 = smov [#allocation13]  }
  0x3a   :  { %101 = dma.hbm_to_vmem [thread:$0]  %s3958_s6, 1280, %s96_s23, [#allocation11], %s3973_s4, %s3973_s4, %s3476_s19  }
  0x3b   :  { %s121_s17 = sshll.u32 %s3480_s22, 4  ;;  %s3481_s20 = smov [#allocation16]   ;;  %s122_s17 = int_to_ptr.vmem [resolvable:$true] %s121_s17 }
  0x3c   :  { %s143_s21 = sshll.u32 %s3481_s20, 4  ;;  %s3239_s27 = scalar_lea.hbm %s3961_s9, 2048  ;;  %s144_s21 = int_to_ptr.vmem [resolvable:$true] %s143_s21 }
  0x3d   :  { %p3240_p10 = scmp.ne.s32.totalorder %s3961_s9, %s3239_s27  ;;  %p3243_p11 = scmp.lt.u32.totalorder %s3239_s27, %s3961_s9 }
  0x3f   :  { %p3245_p12 = pnand %p3243_p11, %p3240_p10 }
  0x41   :  { %3248 = shalt.err (!%p3245_p12)
}
  0x42   :  { %s3249_s6 = scalar_lea.vmem %s122_s17, 2048  ;;  %p3254_p0 = scmp.lt.s32.totalorder %s122_s17, %s122_s17 }
  0x43   :  { %p3250_p13 = scmp.ne.s32.totalorder %s122_s17, %s3249_s6  ;;  %p3255_p1 = scmp.lt.s32.totalorder %s3249_s6, %s3249_s6 }
  0x45   :  { %p3256_p2 = por %p3255_p1, %p3254_p0 }
  0x47   :  { %p3257_p3 = pnand %p3256_p2, %p3250_p13 }
  0x49   :  { %3260 = shalt.err (!%p3257_p3)
}
  0x4a   :  { %s3482_s23 = smov 512   ;;  %s3483_s0 = smov 32  }
  0x4b   :  { %127 = dma.hbm_to_vmem [thread:$0]  %s3961_s9, 2048, %s122_s17, [#allocation14], %s3482_s23, %s3482_s23, %s3483_s0  }
  0x4c   :  { %s3261_s25 = scalar_lea.hbm %s3963_s11, 1536 }
  0x4d   :  { %p3262_p4 = scmp.ne.s32.totalorder %s3963_s11, %s3261_s25  ;;  %p3265_p5 = scmp.lt.u32.totalorder %s3261_s25, %s3963_s11 }
  0x4f   :  { %p3267_p6 = pnand %p3265_p5, %p3262_p4 }
  0x51   :  { %3270 = shalt.err (!%p3267_p6)
}
  0x52   :  { %s3271_s29 = scalar_lea.vmem %s144_s21, 1536  ;;  %p3276_p8 = scmp.lt.s32.totalorder %s144_s21, %s144_s21 }
  0x53   :  { %p3272_p7 = scmp.ne.s32.totalorder %s144_s21, %s3271_s29  ;;  %p3277_p9 = scmp.lt.s32.totalorder %s3271_s29, %s3271_s29 }
  0x55   :  { %p3278_p10 = por %p3277_p9, %p3276_p8 }
  0x57   :  { %p3279_p11 = pnand %p3278_p10, %p3272_p7 }
  0x59   :  { %3282 = shalt.err (!%p3279_p11)
}
  0x5a   :  { %149 = dma.hbm_to_vmem [thread:$0]  %s3963_s11, 1536, %s144_s21, [#allocation17], %s3482_s23, %s3482_s23, %s3483_s0  }
  0x5b   :  { %s3484_s30 = smov [#allocation19]   ;;  %s3485_s24 = smov [#allocation2]  }
  0x5c   :  { %s167_s6 = sshll.u32 %s3484_s30, 4  ;;  %s35_s2 = sshll.u32 %s3485_s24, 4  ;;  %s168_s6 = int_to_ptr.vmem [resolvable:$true] %s167_s6  ;;  %s36_s2 = int_to_ptr.vmem [resolvable:$true] %s35_s2 }
  0x5d   :  { %s3283_s25 = scalar_lea.hbm %s3965_s13, 4096 }
  0x5e   :  { %p3284_p12 = scmp.ne.s32.totalorder %s3965_s13, %s3283_s25  ;;  %p3287_p13 = scmp.lt.u32.totalorder %s3283_s25, %s3965_s13 }
  0x60   :  { %p3289_p0 = pnand %p3287_p13, %p3284_p12 }
  0x62   :  { %3292 = shalt.err (!%p3289_p0)
}
  0x63   :  { %s3293_s11 = scalar_lea.vmem %s168_s6, 4096  ;;  %p3298_p2 = scmp.lt.s32.totalorder %s168_s6, %s168_s6 }
  0x64   :  { %p3294_p1 = scmp.ne.s32.totalorder %s168_s6, %s3293_s11  ;;  %p3299_p3 = scmp.lt.s32.totalorder %s3293_s11, %s3293_s11 }
  0x66   :  { %p3300_p4 = por %p3299_p3, %p3298_p2 }
  0x68   :  { %p3301_p5 = pnand %p3300_p4, %p3294_p1 }
  0x6a   :  { %3304 = shalt.err (!%p3301_p5)
}
  0x6b   :  { %173 = dma.hbm_to_vmem [thread:$0]  %s3965_s13, 4096, %s168_s6, [#allocation20], %s3973_s4, %s3973_s4, %s3476_s19  }
  0x6c   :  { %s3305_s30 = scalar_lea.hbm %s3953_s1, 512 }
  0x6d   :  { %p3306_p6 = scmp.ne.s32.totalorder %s3953_s1, %s3305_s30  ;;  %p3309_p7 = scmp.lt.u32.totalorder %s3305_s30, %s3953_s1 }
  0x6f   :  { %p3311_p8 = pnand %p3309_p7, %p3306_p6 }
  0x71   :  { %3314 = shalt.err (!%p3311_p8)
}
  0x72   :  { %s3315_s26 = scalar_lea.vmem %s36_s2, 512  ;;  %p3320_p10 = scmp.lt.s32.totalorder %s36_s2, %s36_s2 }
  0x73   :  { %p3316_p9 = scmp.ne.s32.totalorder %s36_s2, %s3315_s26  ;;  %p3321_p11 = scmp.lt.s32.totalorder %s3315_s26, %s3315_s26 }
  0x75   :  { %p3322_p12 = por %p3321_p11, %p3320_p10 }
  0x77   :  { %p3323_p13 = pnand %p3322_p12, %p3316_p9 }
  0x79   :  { %3326 = shalt.err (!%p3323_p13)
}
  0x7a   :  { %41 = dma.hbm_to_vmem [thread:$0]  %s3953_s1, 512, %s36_s2, [#allocation3], %s3973_s4, %s3973_s4, %s3476_s19  }
  0x7b   :  { %s3486_s27 = smov [#allocation6]   ;;  %s3487_s28 = smov [#allocation9]  }
  0x7c   :  { %s59_s18 = sshll.u32 %s3486_s27, 4  ;;  %s83_s11 = sshll.u32 %s3487_s28, 4  ;;  %s60_s18 = int_to_ptr.vmem [resolvable:$true] %s59_s18  ;;  %s84_s11 = int_to_ptr.vmem [resolvable:$true] %s83_s11 }
  0x7d   :  { %s3327_s9 = scalar_lea.hbm %s3955_s3, 1024 }
  0x7e   :  { %p3328_p0 = scmp.ne.s32.totalorder %s3955_s3, %s3327_s9  ;;  %p3331_p1 = scmp.lt.u32.totalorder %s3327_s9, %s3955_s3 }
  0x80   :  { %p3333_p2 = pnand %p3331_p1, %p3328_p0 }
  0x82   :  { %3336 = shalt.err (!%p3333_p2)
}
  0x83   :  { %s3337_s1 = scalar_lea.vmem %s60_s18, 1024  ;;  %p3342_p4 = scmp.lt.s32.totalorder %s60_s18, %s60_s18 }
  0x84   :  { %p3338_p3 = scmp.ne.s32.totalorder %s60_s18, %s3337_s1  ;;  %p3343_p5 = scmp.lt.s32.totalorder %s3337_s1, %s3337_s1 }
  0x86   :  { %p3344_p6 = por %p3343_p5, %p3342_p4 }
  0x88   :  { %p3345_p7 = pnand %p3344_p6, %p3338_p3 }
  0x8a   :  { %3348 = shalt.err (!%p3345_p7)
}
  0x8b   :  { %65 = dma.hbm_to_vmem [thread:$0]  %s3955_s3, 1024, %s60_s18, [#allocation5], %s3973_s4, %s3973_s4, %s3476_s19  }
  0x8c   :  { %s3349_s13 = scalar_lea.hbm %s3957_s5, 4864 }
  0x8d   :  { %p3350_p8 = scmp.ne.s32.totalorder %s3957_s5, %s3349_s13  ;;  %p3353_p9 = scmp.lt.u32.totalorder %s3349_s13, %s3957_s5 }
  0x8f   :  { %p3355_p10 = pnand %p3353_p9, %p3350_p8 }
  0x91   :  { %3358 = shalt.err (!%p3355_p10)
}
  0x92   :  { %s3359_s29 = scalar_lea.vmem %s84_s11, 4864  ;;  %p3364_p12 = scmp.lt.s32.totalorder %s84_s11, %s84_s11 }
  0x93   :  { %p3360_p11 = scmp.ne.s32.totalorder %s84_s11, %s3359_s29  ;;  %p3365_p13 = scmp.lt.s32.totalorder %s3359_s29, %s3359_s29 }
  0x95   :  { %p3366_p0 = por %p3365_p13, %p3364_p12 }
  0x97   :  { %p3367_p1 = pnand %p3366_p0, %p3360_p11 }
  0x99   :  { %3370 = shalt.err (!%p3367_p1)
}
  0x9a   :  { %89 = dma.hbm_to_vmem [thread:$0]  %s3957_s5, 4864, %s84_s11, [#allocation8], %s3973_s4, %s3973_s4, %s3476_s19  }
  0x9b   :  { %s3488_s9 = smov [#allocation12]   ;;  %s3489_s30 = smov [#allocation15]  }
  0x9c   :  { %s109_s17 = sshll.u32 %s3488_s9, 4  ;;  %s134_s24 = sshll.u32 %s3489_s30, 4  ;;  %s110_s17 = int_to_ptr.vmem [resolvable:$true] %s109_s17  ;;  %s135_s24 = int_to_ptr.vmem [resolvable:$true] %s134_s24 }
  0x9d   :  { %s3371_s2 = scalar_lea.hbm %s3960_s8, 1024 }
  0x9e   :  { %p3372_p2 = scmp.ne.s32.totalorder %s3960_s8, %s3371_s2  ;;  %p3375_p3 = scmp.lt.u32.totalorder %s3371_s2, %s3960_s8 }
  0xa0   :  { %p3377_p4 = pnand %p3375_p3, %p3372_p2 }
  0xa2   :  { %3380 = shalt.err (!%p3377_p4)
}
  0xa3   :  { %s3381_s5 = scalar_lea.vmem %s110_s17, 1024  ;;  %p3386_p6 = scmp.lt.s32.totalorder %s110_s17, %s110_s17 }
  0xa4   :  { %p3382_p5 = scmp.ne.s32.totalorder %s110_s17, %s3381_s5  ;;  %p3387_p7 = scmp.lt.s32.totalorder %s3381_s5, %s3381_s5 }
  0xa6   :  { %p3388_p8 = por %p3387_p7, %p3386_p6 }
  0xa8   :  { %p3389_p9 = pnand %p3388_p8, %p3382_p5 }
  0xaa   :  { %3392 = shalt.err (!%p3389_p9)
}
  0xab   :  { %115 = dma.hbm_to_vmem [thread:$0]  %s3960_s8, 1024, %s110_s17, [#allocation11], %s3482_s23, %s3482_s23, %s3483_s0  }
  0xac   :  { %s3393_s21 = scalar_lea.hbm %s3962_s10, 256 }
  0xad   :  { %p3394_p10 = scmp.ne.s32.totalorder %s3962_s10, %s3393_s21  ;;  %p3397_p11 = scmp.lt.u32.totalorder %s3393_s21, %s3962_s10 }
  0xaf   :  { %p3399_p12 = pnand %p3397_p11, %p3394_p10 }
  0xb1   :  { %3402 = shalt.err (!%p3399_p12)
}
  0xb2   :  { %s3403_s30 = scalar_lea.vmem %s135_s24, 256  ;;  %p3408_p0 = scmp.lt.s32.totalorder %s135_s24, %s135_s24 }
  0xb3   :  { %p3404_p13 = scmp.ne.s32.totalorder %s135_s24, %s3403_s30  ;;  %p3409_p1 = scmp.lt.s32.totalorder %s3403_s30, %s3403_s30 }
  0xb5   :  { %p3410_p2 = por %p3409_p1, %p3408_p0 }
  0xb7   :  { %p3411_p3 = pnand %p3410_p2, %p3404_p13 }
  0xb9   :  { %3414 = shalt.err (!%p3411_p3)
}
  0xba   :  { %137 = dma.hbm_to_vmem [thread:$0]  %s3962_s10, 256, %s135_s24, [#allocation14]  }
  0xbb   :  { %s3490_s0 = smov [#allocation18]   ;;  %s3415_s2 = scalar_lea.hbm %s3964_s12, 16384 }
  0xbc   :  { %s155_s17 = sshll.u32 %s3490_s0, 4  ;;  %p3416_p4 = scmp.ne.s32.totalorder %s3964_s12, %s3415_s2  ;;  %s156_s17 = int_to_ptr.vmem [resolvable:$true] %s155_s17 }
  0xbd   :  { %p3419_p5 = scmp.lt.u32.totalorder %s3415_s2, %s3964_s12 }
  0xbf   :  { %p3421_p6 = pnand %p3419_p5, %p3416_p4 }
  0xc1   :  { %3424 = shalt.err (!%p3421_p6)
}
  0xc2   :  { %s3425_s5 = scalar_lea.vmem %s156_s17, 16384  ;;  %p3430_p8 = scmp.lt.s32.totalorder %s156_s17, %s156_s17 }
  0xc3   :  { %p3426_p7 = scmp.ne.s32.totalorder %s156_s17, %s3425_s5  ;;  %p3431_p9 = scmp.lt.s32.totalorder %s3425_s5, %s3425_s5 }
  0xc5   :  { %p3432_p10 = por %p3431_p9, %p3430_p8 }
  0xc7   :  { %p3433_p11 = pnand %p3432_p10, %p3426_p7 }
  0xc9   :  { %3436 = shalt.err (!%p3433_p11)
}
  0xca   :  { %s3491_s10 = smov 256   ;;  %s3492_s24 = smov 16  }
  0xcb   :  { %161 = dma.hbm_to_vmem [thread:$0]  %s3964_s12, 16384, %s156_s17, [#allocation17], %s3491_s10, %s3491_s10, %s3492_s24  }
  0xcc   :  { %s3493_s27 = smov [#allocation21]   ;;  %s3437_s3 = scalar_lea.hbm %s3966_s14, 2048 }
  0xcd   :  { %s179_s28 = sshll.u32 %s3493_s27, 4  ;;  %p3438_p12 = scmp.ne.s32.totalorder %s3966_s14, %s3437_s3  ;;  %s180_s28 = int_to_ptr.vmem [resolvable:$true] %s179_s28 }
  0xce   :  { %p3441_p13 = scmp.lt.u32.totalorder %s3437_s3, %s3966_s14 }
  0xd0   :  { %p3443_p0 = pnand %p3441_p13, %p3438_p12 }
  0xd2   :  { %3446 = shalt.err (!%p3443_p0)
}
  0xd3   :  { %s3447_s23 = scalar_lea.vmem %s180_s28, 2048  ;;  %p3452_p2 = scmp.lt.s32.totalorder %s180_s28, %s180_s28 }
  0xd4   :  { %p3448_p1 = scmp.ne.s32.totalorder %s180_s28, %s3447_s23  ;;  %p3453_p3 = scmp.lt.s32.totalorder %s3447_s23, %s3447_s23 }
  0xd6   :  { %p3454_p4 = por %p3453_p3, %p3452_p2 }
  0xd8   :  { %p3455_p5 = pnand %p3454_p4, %p3448_p1 }
  0xda   :  { %3458 = shalt.err (!%p3455_p5)
}
  0xdb   :  { %185 = dma.hbm_to_vmem [thread:$0]  %s3966_s14, 2048, %s180_s28, [#allocation20], %s3973_s4, %s3973_s4, %s3476_s19  }
  0xdc   :  { %3459 = dma.done.wait [#allocation3], 512  }
  0xdd   :  { %3460 = vsyncadd [#allocation3], 4294966784 }
  0xde   :  { %3461 = dma.done.wait [#allocation5], 3072  }
  0xdf   :  { %3462 = vsyncadd [#allocation5], 4294964224 }
  0xe0   :  { %3463 = dma.done.wait [#allocation8], 12544  }
  0xe1   :  { %3464 = vsyncadd [#allocation8], 4294954752 }
  0xe2   :  { %3465 = dma.done.wait [#allocation11], 2304  }
  0xe3   :  { %3466 = vsyncadd [#allocation11], 4294964992 }
  0xe4   :  { %3467 = dma.done.wait [#allocation14], 2304  }
  0xe5   :  { %3468 = vsyncadd [#allocation14], 4294964992 }
  0xe6   :  { %3469 = dma.done.wait [#allocation17], 17920  }
  0xe7   :  { %3470 = vsyncadd [#allocation17], 4294949376 }
  0xe8   :  { %3471 = dma.done.wait [#allocation20], 6144  }
  0xe9   :  { %3472 = vsyncadd [#allocation20], 4294961152  ;;  %v3494_v0 = vmov 0.0|0.0   ;;  %vm3495_vm0 = vmmov 0   ;;  %v3496_v1 = vmov 0.0   ;;  %s3974_s4 = sld [smem:[#allocation29_spill]] }
  0xea   :  { %2703 = vmatprep.subr.bf16.mxu0 %v3494_v0  ;;  %2562 = vmatprep.mubr.msk.f32.mxu0 %vm3495_vm0, %v3496_v1  ;;  %v229_v3 = vld [vmem:[#allocation2] sm:$0xff]  ;;  %v230_v4 = vld [vmem:[#allocation2 + $0x8] sm:$0xff]  ;;  %s3497_s17 = smov 112   ;;  %v231_v6 = vld [vmem:[#allocation2 + $0x10] sm:$0xff]  ;;  %vm243_vm1 = vcmask 261120   ;;  %s3498_s2 = smov 68  }
  0xeb   :  { %2709 = vmatprep.subr.bf16.mxu1 %v3494_v0  ;;  %2597 = vmatprep.mubr.msk.f32.mxu1 %vm3495_vm0, %v3496_v1  ;;  %v2704_v5 = vpack.c.bf16 %v230_v4, %v229_v3  ;;  %v232_v7 = vld [vmem:[#allocation2 + $0x18] sm:$0xff]  ;;  %v322_v8 = vld [vmem:[#allocation4] sm:$0xff]  ;;  %v323_v9 = vld [vmem:[#allocation4 + $0x8] sm:$0xff]  ;;  %vm593_vm3 = vcmask 556032   ;;  %vm436_vm4 = vcmask 523264   ;;  %vm806_vm8 = vcmask 1043456  }
  0xec   :  { %v324_v10 = vld [vmem:[#allocation4 + $0x10] sm:$0xff]  ;;  %v325_v11 = vld [vmem:[#allocation4 + $0x18] sm:$0xff]  ;;  %v2707_v12 = vpack.c.bf16 %v232_v7, %v231_v6  ;;  %v2710_v13 = vpack.c.bf16 %v323_v9, %v322_v8  ;;  %v326_v15 = vld [vmem:[#allocation4 + $0x20] sm:$0xff]  ;;  %vm3499_vm9 = vmmov 1   ;;  %vm802_vm12 = vcmask 359424   ;;  %s3500_s23 = smov 80  }
  0xed   :  { %2705 = vmatpush3.bf16.msra.mxu0 %v2704_v5  ;;  %v2713_v14 = vpack.c.bf16 %v325_v11, %v324_v10  ;;  %v327_v16 = vld [vmem:[#allocation4 + $0x28] sm:$0xff]  ;;  %v328_v19 = vld [vmem:[#allocation4 + $0x30] sm:$0xff]  ;;  %v329_v20 = vld [vmem:[#allocation4 + $0x38] sm:$0xff]  ;;  %vm973_vm13 = vcmask 654336   ;;  %vm1068_vm15 = vcmask 1045504  }
  0xee   :  { %2706 = vmatprep.subr.bf16.mxu0 %v3494_v0  ;;  %2711 = vmatpush3.bf16.msra.mxu1 %v2710_v13  ;;  %v2716_v17 = vpack.c.bf16 %v327_v16, %v326_v15  ;;  %v2719_v21 = vpack.c.bf16 %v329_v20, %v328_v19  ;;  %v330_v22 = vld [vmem:[#allocation4 + $0x40] sm:$0xff]  ;;  %v331_v23 = vld [vmem:[#allocation4 + $0x48] sm:$0xff]  ;;  %v332_v25 = vld [vmem:[#allocation4 + $0x50] sm:$0xff] }
  0xef   :  { %v3788_v2 = vld [vmem:[%s3974_s4] sm:$0xff]  ;;  %2712 = vmatprep.subr.bf16.mxu1 %v3494_v0  ;;  %v2722_v24 = vpack.c.bf16 %v331_v23, %v330_v22  ;;  %v333_v26 = vld [vmem:[#allocation4 + $0x58] sm:$0xff]  ;;  %v334_v27 = vld [vmem:[#allocation4 + $0x60] sm:$0xff] }
  0xf0   :  { %241 = vrot.lane.b32.xlu0 %v3788_v2, %s3497_s17  ;;  %v2725_v28 = vpack.c.bf16 %v333_v26, %v332_v25  ;;  %v335_v29 = vld [vmem:[#allocation4 + $0x68] sm:$0xff]  ;;  %v336_v31 = vld [vmem:[#allocation4 + $0x70] sm:$0xff]  ;;  %v337_v32 = vld [vmem:[#allocation4 + $0x78] sm:$0xff] }
  0xf1   :  { %2708 = vmatpush3.bf16.msra.mxu0 %v2707_v12  ;;  %v2728_v30 = vpack.c.bf16 %v335_v29, %v334_v27  ;;  %v2731_v33 = vpack.c.bf16 %v337_v32, %v336_v31  ;;  %v228_v34 = vld [vmem:[%s3974_s4 + $0x8] sm:$0xff]  ;;  %v2365_v35 = vld [vmem:[%s3967_s15] ss:$0 sm:$0xff]  ;;  %v421_v47 = vld [vmem:[#allocation6] sm:$0xff] }
  0xf2   :  { %2733 = vmatprep.subr.bf16.mxu0 %v3494_v0  ;;  %2714 = vmatpush3.bf16.msra.mxu1 %v2713_v14  ;;  %v513_v44 = vld [vmem:[#allocation7 + $0x10] sm:$0xff]  ;;  %v516_v45 = vld [vmem:[#allocation7 + $0x28] sm:$0xff]  ;;  %v519_v50 = vld [vmem:[#allocation7 + $0x40] sm:$0xff] }
  0xf3   :  { %2715 = vmatprep.subr.bf16.mxu1 %v3494_v0  ;;  %591 = vrot.lane.b32.xlu1 %v228_v34, %s3498_s2  ;;  %v2786_v46 = vpack.c.bf16 %v516_v45, %v513_v44  ;;  %v422_v48 = vld [vmem:[#allocation6 + $0x8] sm:$0xff]  ;;  %v522_v51 = vld [vmem:[#allocation7 + $0x58] sm:$0xff]  ;;  %v423_v53 = vld [vmem:[#allocation6 + $0x10] sm:$0xff] }
  0xf4   :  { %589 = vrot.lane.b32.xlu0 %v3788_v2, %s3498_s2  ;;  %v2734_v49 = vpack.c.bf16 %v422_v48, %v421_v47  ;;  %v2789_v52 = vpack.c.bf16 %v522_v51, %v519_v50  ;;  %v424_v54 = vld [vmem:[#allocation6 + $0x18] sm:$0xff]  ;;  %v525_v56 = vld [vmem:[#allocation7 + $0x70] sm:$0xff]  ;;  %v528_v57 = vld [vmem:[#allocation7 + $0x88] sm:$0xff] }
  0xf5   :  { %v2737_v55 = vpack.c.bf16 %v424_v54, %v423_v53  ;;  %v2792_v58 = vpack.c.bf16 %v528_v57, %v525_v56  ;;  %v425_v59 = vld [vmem:[#allocation6 + $0x20] sm:$0xff]  ;;  %v426_v60 = vld [vmem:[#allocation6 + $0x28] sm:$0xff]  ;;  %v534_v63 = vld [vmem:[#allocation7 + $0xb8] sm:$0xff] }
  0xf6   :  { %2717 = vmatpush3.bf16.msra.mxu1 %v2716_v17  ;;  %v2740_v61 = vpack.c.bf16 %v426_v60, %v425_v59  ;;  %v531_v62 = vld [vmem:[#allocation7 + $0xa0] sm:$0xff]  ;;  %v427_v4 = vld [vmem:[#allocation6 + $0x30] sm:$0xff]  ;;  %v428_v5 = vld [vmem:[#allocation6 + $0x38] sm:$0xff] }
  0xf7   :  { %2718 = vmatprep.subr.bf16.mxu1 %v3494_v0  ;;  %v2795_v3 = vpack.c.bf16 %v534_v63, %v531_v62  ;;  %v2743_v6 = vpack.c.bf16 %v428_v5, %v427_v4  ;;  %v512_v7 = vld [vmem:[#allocation7 + $0x8] sm:$0xff]  ;;  %v515_v8 = vld [vmem:[#allocation7 + $0x20] sm:$0xff]  ;;  %v537_v9 = vld [vmem:[#allocation7 + $0xd0] sm:$0xff]  ;;  %1464 = vrot.lane.b32.xlu1 %v3788_v2, %s3500_s23 }
  0xf8   :  { %v2745_v10 = vpack.c.bf16 %v515_v8, %v512_v7  ;;  %v540_v11 = vld [vmem:[#allocation7 + $0xe8] sm:$0xff]  ;;  %v543_v13 = vld [vmem:[#allocation7 + $0x100] sm:$0xff]  ;;  %v546_v14 = vld [vmem:[#allocation7 + $0x118] sm:$0xff] }
  0xf9   :  { %v2798_v12 = vpack.c.bf16 %v540_v11, %v537_v9  ;;  %v2801_v15 = vpack.c.bf16 %v546_v14, %v543_v13  ;;  %v549_v16 = vld [vmem:[#allocation7 + $0x130] sm:$0xff]  ;;  %v552_v17 = vld [vmem:[#allocation7 + $0x148] sm:$0xff]  ;;  %v555_v19 = vld [vmem:[#allocation7 + $0x160] sm:$0xff] }
  0xfa   :  { %2720 = vmatpush3.bf16.msra.mxu1 %v2719_v21  ;;  %v558_v20 = vld [vmem:[#allocation7 + $0x178] sm:$0xff]  ;;  %v561_v22 = vld [vmem:[#allocation7 + $0x190] sm:$0xff]  ;;  %v564_v23 = vld [vmem:[#allocation7 + $0x1a8] sm:$0xff] }
  0xfb   :  { %2721 = vmatprep.subr.bf16.mxu1 %v3494_v0  ;;  %v2807_v21 = vpack.c.bf16 %v558_v20, %v555_v19  ;;  %v567_v25 = vld [vmem:[#allocation7 + $0x1c0] sm:$0xff]  ;;  %v570_v26 = vld [vmem:[#allocation7 + $0x1d8] sm:$0xff]  ;;  %v2368_v31 = vld [vmem:[%s3967_s15 + $0x1] ss:$0 sm:$0xff] }
  0xfc   :  { %v517_v45 = vld [vmem:[#allocation7 + $0x30] sm:$0xff]  ;;  %v524_v48 = vld [vmem:[#allocation7 + $0x68] sm:$0xff]  ;;  %v526_v53 = vld [vmem:[#allocation7 + $0x78] sm:$0xff] }
  0xfd   :  { %v530_v54 = vld [vmem:[#allocation7 + $0x98] sm:$0xff]  ;;  %v532_v59 = vld [vmem:[#allocation7 + $0xa8] sm:$0xff]  ;;  %v541_v9 = vld [vmem:[#allocation7 + $0xf0] sm:$0xff] }
  0xfe   :  { %2723 = vmatpush3.bf16.msra.mxu1 %v2722_v24  ;;  %v2810_v24 = vpack.c.bf16 %v564_v23, %v561_v22  ;;  %v536_v60 = vld [vmem:[#allocation7 + $0xc8] sm:$0xff]  ;;  %v538_v4 = vld [vmem:[#allocation7 + $0xd8] sm:$0xff]  ;;  %vm2855_vm10 = vmpackc.low %vm806_vm8, %vm3499_vm9 }
  0xff   :  { %2724 = vmatprep.subr.bf16.mxu1 %v3494_v0  ;;  %v542_v5 = vld [vmem:[#allocation7 + $0xf8] sm:$0xff]  ;;  %v548_v11 = vld [vmem:[#allocation7 + $0x128] sm:$0xff] }
 0x100   :  { %v556_v22 = vld [vmem:[#allocation7 + $0x168] sm:$0xff] }
 0x101   :  { %v560_v23 = vld [vmem:[#allocation7 + $0x188] sm:$0xff] }
 0x102   :  { %2726 = vmatpush3.bf16.msra.mxu1 %v2725_v28  ;;  %v2813_v28 = vpack.c.bf16 %v570_v26, %v567_v25 }
 0x103   :  { %2727 = vmatprep.subr.bf16.mxu1 %v3494_v0 }
 0x106   :  { %2729 = vmatpush3.bf16.msra.mxu1 %v2728_v30 }
 0x107   :  { %2730 = vmatprep.subr.bf16.mxu1 %v3494_v0 }
 0x10a   :  { %2732 = vmatpush3.bf16.msra.mxu1 %v2731_v33 }
 0x10b   :  { %2785 = vmatprep.subr.bf16.mxu1 %v3494_v0 }
 0x162   :  { %v242_v18 = vpop.permute.xlu0 %241 }
 0x163   :  { %2563 = vmatmul.mubr.msk.f32.vlgmr.msra.gmra.mrb[0].mxu0 %vm243_vm1, %v242_v18  ;;  %v2804_v18 = vpack.c.bf16 %v552_v17, %v549_v16  ;;  %v550_v16 = vld [vmem:[#allocation7 + $0x138] sm:$0xff] }
 0x164   :  { %2616 = vmatprep.mubr.msk.f32.mxu0 %vm3495_vm0, %v3496_v1  ;;  %2735 = vmatpush3.bf16.msra.mxu0 %v2734_v49  ;;  %v527_v49 = vld [vmem:[#allocation7 + $0x80] sm:$0xff]  ;;  %v554_v17 = vld [vmem:[#allocation7 + $0x158] sm:$0xff] }
 0x165   :  { %2736 = vmatprep.subr.bf16.mxu0 %v3494_v0  ;;  %v592_v27 = vpop.permute.xlu1 %591  ;;  %v2753_v51 = vpack.c.bf16 %v527_v49, %v524_v48  ;;  %v777_v48 = vld [vmem:[#allocation9 + $0xa0] sm:$0xff]  ;;  %v778_v49 = vld [vmem:[#allocation9 + $0xa8] sm:$0xff] }
 0x166   :  { %v590_v29 = vpop.permute.xlu0 %589 }
 0x167   :  { %v3824_v30 = vsel %vm593_vm3, %v590_v29, %v592_v27  ;;  %v566_v29 = vld [vmem:[#allocation7 + $0x1b8] sm:$0xff]  ;;  %vm1064_vm3 = vcmask 244736  }
 0x168   :  { %2738 = vmatpush3.bf16.msra.mxu0 %v2737_v55  ;;  %v533_v55 = vld [vmem:[#allocation7 + $0xb0] sm:$0xff] }
 0x169   :  { %2739 = vmatprep.subr.bf16.mxu0 %v3494_v0  ;;  %v2757_v57 = vpack.c.bf16 %v533_v55, %v530_v54 }
 0x16c   :  { %2741 = vmatpush3.bf16.msra.mxu0 %v2740_v61  ;;  %v539_v61 = vld [vmem:[#allocation7 + $0xe0] sm:$0xff] }
 0x16d   :  { %2742 = vmatprep.subr.bf16.mxu0 %v3494_v0  ;;  %v2761_v63 = vpack.c.bf16 %v539_v61, %v536_v60  ;;  %v764_v60 = vld [vmem:[#allocation9 + $0x38] sm:$0xff] }
 0x170   :  { %2744 = vmatpush3.bf16.msra.mxu0 %v2743_v6  ;;  %v545_v6 = vld [vmem:[#allocation7 + $0x110] sm:$0xff] }
 0x171   :  { %2746 = vmatprep.subr.bf16.mxu0 %v2745_v10  ;;  %v2765_v8 = vpack.c.bf16 %v545_v6, %v542_v5  ;;  %v544_v10 = vld [vmem:[#allocation7 + $0x108] sm:$0xff] }
 0x172   :  { %v2767_v13 = vpack.c.bf16 %v544_v10, %v541_v9  ;;  %v766_v5 = vld [vmem:[#allocation9 + $0x48] sm:$0xff]  ;;  %v767_v10 = vld [vmem:[#allocation9 + $0x50] sm:$0xff] }
 0x236   :  { %v312_v36 = vpop.f32.mrb[0].mxu0 }
 0x237   :  { %v313_v37 = vadd.f32 %v2365_v35, %v312_v36  ;;  %v2564_v38 = vpop.f32.mrb[1].mxu0 }
 0x238   :  { %v514_v38 = vld [vmem:[#allocation7 + $0x18] sm:$0xff] }
 0x239   :  { %v317_v39 = vmin.f32 %v313_v37, 0.0  ;;  %vm316_vm2 = vcmp.gt.f32.partialorder %v313_v37, 0.0 }
 0x23b   :  { %v318_v40 = vmul.f32 1.442695, %v317_v39  ;;  %v518_v39 = vld [vmem:[#allocation7 + $0x38] sm:$0xff] }
 0x23d   :  { %3141 = vpow2.f32 %v318_v40  ;;  %v521_v40 = vld [vmem:[#allocation7 + $0x50] sm:$0xff] }
 0x23e   :  { %v2749_v44 = vpack.c.bf16 %v521_v40, %v518_v39  ;;  %v757_v40 = vld [vmem:[#allocation9] sm:$0xff] }
 0x247   :  { %v3142_v41 = vpop.eup %3141 }
 0x248   :  { %v2367_v42 = vadd.f32 -1.0, %v3142_v41 }
 0x24a   :  { %v321_v43 = vsel %vm316_vm2, %v313_v37, %v2367_v42  ;;  %v511_v37 = vld [vmem:[#allocation7] sm:$0xff]  ;;  %vm2877_vm2 = vmpackc.low %vm1068_vm15, %vm3499_vm9 }
 0x24b   :  { %2598 = vmatmul.mubr.f32.vlgmr.msra.gmra.mrb[0].mxu1 %v321_v43  ;;  %v2747_v43 = vpack.c.bf16 %v514_v38, %v511_v37  ;;  %v773_v37 = vld [vmem:[#allocation9 + $0x80] sm:$0xff]  ;;  %v774_v38 = vld [vmem:[#allocation9 + $0x88] sm:$0xff] }
 0x24c   :  { %2787 = vmatpush1.bf16.msra.mxu1 %v2786_v46  ;;  %2373 = vmatprep.mubr.msk.f32.mxu1 %vm243_vm1, %v592_v27  ;;  %v520_v46 = vld [vmem:[#allocation7 + $0x48] sm:$0xff]  ;;  %v2815_v39 = vpack.c.bf16 %v774_v38, %v773_v37 }
 0x24d   :  { %2788 = vmatprep.subr.bf16.mxu1 %v3494_v0  ;;  %v2751_v50 = vpack.c.bf16 %v520_v46, %v517_v45  ;;  %v759_v45 = vld [vmem:[#allocation9 + $0x10] sm:$0xff]  ;;  %v760_v46 = vld [vmem:[#allocation9 + $0x18] sm:$0xff] }
 0x250   :  { %2790 = vmatpush1.bf16.msra.mxu1 %v2789_v52  ;;  %v523_v52 = vld [vmem:[#allocation7 + $0x60] sm:$0xff] }
 0x251   :  { %2791 = vmatprep.subr.bf16.mxu1 %v3494_v0  ;;  %v2755_v56 = vpack.c.bf16 %v526_v53, %v523_v52  ;;  %v762_v52 = vld [vmem:[#allocation9 + $0x28] sm:$0xff] }
 0x254   :  { %2793 = vmatpush1.bf16.msra.mxu1 %v2792_v58  ;;  %v529_v58 = vld [vmem:[#allocation7 + $0x90] sm:$0xff] }
 0x255   :  { %2794 = vmatprep.subr.bf16.mxu1 %v3494_v0  ;;  %v2759_v62 = vpack.c.bf16 %v532_v59, %v529_v58  ;;  %v763_v59 = vld [vmem:[#allocation9 + $0x30] sm:$0xff] }
 0x256   :  { %v2829_v61 = vpack.c.bf16 %v764_v60, %v763_v59  ;;  %v793_v59 = vld [vmem:[#allocation9 + $0x120] sm:$0xff]  ;;  %v794_v60 = vld [vmem:[#allocation9 + $0x128] sm:$0xf] }
 0x258   :  { %2796 = vmatpush1.bf16.msra.mxu1 %v2795_v3  ;;  %v535_v3 = vld [vmem:[#allocation7 + $0xc0] sm:$0xff] }
 0x259   :  { %2797 = vmatprep.subr.bf16.mxu1 %v3494_v0  ;;  %v2763_v7 = vpack.c.bf16 %v538_v4, %v535_v3  ;;  %v765_v4 = vld [vmem:[#allocation9 + $0x40] sm:$0xff] }
 0x25a   :  { %v2833_v6 = vpack.c.bf16 %v766_v5, %v765_v4  ;;  %v956_v4 = vld [vmem:[#allocation10] sm:$0xff]  ;;  %v957_v5 = vld [vmem:[#allocation10 + $0x8] sm:$0xff] }
 0x25c   :  { %2799 = vmatpush1.bf16.msra.mxu1 %v2798_v12  ;;  %v551_v12 = vld [vmem:[#allocation7 + $0x140] sm:$0xff] }
 0x25d   :  { %2800 = vmatprep.subr.bf16.mxu1 %v3494_v0  ;;  %v2769_v14 = vpack.c.bf16 %v551_v12, %v548_v11  ;;  %v768_v11 = vld [vmem:[#allocation9 + $0x58] sm:$0xff]  ;;  %v785_v12 = vld [vmem:[#allocation9 + $0xe0] sm:$0xff] }
 0x260   :  { %2802 = vmatpush1.bf16.msra.mxu1 %v2801_v15  ;;  %v547_v15 = vld [vmem:[#allocation7 + $0x120] sm:$0xff] }
 0x261   :  { %2803 = vmatprep.subr.bf16.mxu1 %v3494_v0  ;;  %v2771_v19 = vpack.c.bf16 %v550_v16, %v547_v15  ;;  %v769_v15 = vld [vmem:[#allocation9 + $0x60] sm:$0xff]  ;;  %v770_v16 = vld [vmem:[#allocation9 + $0x68] sm:$0xff] }
 0x264   :  { %2805 = vmatpush1.bf16.msra.mxu1 %v2804_v18  ;;  %v557_v18 = vld [vmem:[#allocation7 + $0x170] sm:$0xff] }
 0x265   :  { %2806 = vmatprep.subr.bf16.mxu1 %v3494_v0  ;;  %v2773_v20 = vpack.c.bf16 %v557_v18, %v554_v17  ;;  %v787_v18 = vld [vmem:[#allocation9 + $0xf0] sm:$0xff] }
 0x268   :  { %2808 = vmatpush1.bf16.msra.mxu1 %v2807_v21  ;;  %v553_v21 = vld [vmem:[#allocation7 + $0x150] sm:$0xff] }
 0x269   :  { %2809 = vmatprep.subr.bf16.mxu1 %v3494_v0  ;;  %v2775_v25 = vpack.c.bf16 %v556_v22, %v553_v21  ;;  %v771_v22 = vld [vmem:[#allocation9 + $0x70] sm:$0xff] }
 0x26c   :  { %2811 = vmatpush1.bf16.msra.mxu1 %v2810_v24  ;;  %v563_v24 = vld [vmem:[#allocation7 + $0x1a0] sm:$0xff] }
 0x26d   :  { %2812 = vmatprep.subr.bf16.mxu1 %v3494_v0  ;;  %v2777_v26 = vpack.c.bf16 %v563_v24, %v560_v23  ;;  %v772_v23 = vld [vmem:[#allocation9 + $0x78] sm:$0xff] }
 0x26e   :  { %v2845_v24 = vpack.c.bf16 %v772_v23, %v771_v22 }
 0x270   :  { %2814 = vmatpush1.bf16.msra.mxu1 %v2813_v28  ;;  %v562_v28 = vld [vmem:[#allocation7 + $0x198] sm:$0xff] }
 0x271   :  { %2816 = vmatprep.subr.bf16.mxu1 %v2815_v39 }
 0x273   :  { %734 = vmatmul.mubr.f32.vlgmr.msra.gmra.mrb[2].mxu1 %v3824_v30 }
 0x31e   :  { %v411_v32 = vpop.f32.mrb[0].mxu1 }
 0x31f   :  { %v412_v33 = vadd.f32 %v2368_v31, %v411_v32  ;;  %v2599_v34 = vpop.f32.mrb[1].mxu1  ;;  %v569_v31 = vld [vmem:[#allocation7 + $0x1d0] sm:$0xff] }
 0x320   :  { %v565_v34 = vld [vmem:[#allocation7 + $0x1b0] sm:$0xff] }
 0x321   :  { %v416_v35 = vmin.f32 %v412_v33, 0.0  ;;  %vm415_vm5 = vcmp.gt.f32.partialorder %v412_v33, 0.0 }
 0x323   :  { %v417_v36 = vmul.f32 1.442695, %v416_v35  ;;  %v568_v35 = vld [vmem:[#allocation7 + $0x1c8] sm:$0xff] }
 0x325   :  { %3143 = vpow2.f32 %v417_v36  ;;  %v2783_v36 = vpack.c.bf16 %v568_v35, %v565_v34 }
 0x32f   :  { %v3144_v41 = vpop.eup %3143 }
 0x330   :  { %v2369_v42 = vadd.f32 -1.0, %v3144_v41  ;;  %v758_v41 = vld [vmem:[#allocation9 + $0x8] sm:$0xff] }
 0x332   :  { %v420_v47 = vsel %vm415_vm5, %v412_v33, %v2369_v42  ;;  %v2781_v33 = vpack.c.bf16 %v569_v31, %v566_v29  ;;  %v775_v42 = vld [vmem:[#allocation9 + $0x90] sm:$0xff]  ;;  %vm1317_vm5 = vcmask 130048  }
 0x333   :  { %2617 = vmatmul.mubr.msk.f32.vlgmr.msra.gmra.mrb[2].mxu0 %vm436_vm4, %v420_v47 }
 0x334   :  { %2748 = vmatpush1.bf16.msra.mxu0 %v2747_v43  ;;  %2372 = vmatprep.mubr.msk.f32.mxu0 %vm243_vm1, %v592_v27  ;;  %v559_v27 = vld [vmem:[#allocation7 + $0x180] sm:$0xff]  ;;  %v2817_v43 = vpack.c.bf16 %v758_v41, %v757_v40 }
 0x335   :  { %2750 = vmatprep.subr.bf16.mxu0 %v2749_v44  ;;  %v2779_v32 = vpack.c.bf16 %v562_v28, %v559_v27  ;;  %v776_v44 = vld [vmem:[#allocation9 + $0x98] sm:$0xff]  ;;  %v573_v27 = vlaneseq }
 0x336   :  { %v2819_v47 = vpack.c.bf16 %v776_v44, %v775_v42  ;;  %2818 = vmatpush3.bf16.msra.mxu1 %v2817_v43 }
 0x337   :  { %v3838_v28 = vshrl.u32 %v573_v27, 7 }
 0x338   :  { %2752 = vmatpush1.bf16.msra.mxu0 %v2751_v50  ;;  %v2821_v50 = vpack.c.bf16 %v760_v46, %v759_v45  ;;  %2820 = vmatprep.subr.bf16.mxu1 %v2819_v47 }
 0x339   :  { %2754 = vmatprep.subr.bf16.mxu0 %v2753_v51  ;;  %v761_v51 = vld [vmem:[#allocation9 + $0x20] sm:$0xff]  ;;  %v3841_v29 = vsub.s32 0, %v3838_v28  ;;  %v3844_v31 = vsub.s32 1, %v3838_v28 }
 0x33a   :  { %2822 = vmatpush3.bf16.msra.mxu1 %v2821_v50  ;;  %v2825_v53 = vpack.c.bf16 %v762_v52, %v761_v51  ;;  %v790_v50 = vld [vmem:[#allocation9 + $0x108] sm:$0xff] }
 0x33c   :  { %2756 = vmatpush1.bf16.msra.mxu0 %v2755_v56  ;;  %v779_v56 = vld [vmem:[#allocation9 + $0xb0] sm:$0xff] }
 0x33d   :  { %2758 = vmatprep.subr.bf16.mxu0 %v2757_v57  ;;  %v780_v57 = vld [vmem:[#allocation9 + $0xb8] sm:$0xff] }
 0x33e   :  { %v2827_v58 = vpack.c.bf16 %v780_v57, %v779_v56  ;;  %v791_v56 = vld [vmem:[#allocation9 + $0x110] sm:$0xff]  ;;  %v792_v57 = vld [vmem:[#allocation9 + $0x118] sm:$0xff] }
 0x340   :  { %2760 = vmatpush1.bf16.msra.mxu0 %v2759_v62  ;;  %v781_v62 = vld [vmem:[#allocation9 + $0xc0] sm:$0xff] }
 0x341   :  { %2762 = vmatprep.subr.bf16.mxu0 %v2761_v63  ;;  %v782_v63 = vld [vmem:[#allocation9 + $0xc8] sm:$0xff] }
 0x342   :  { %v2831_v3 = vpack.c.bf16 %v782_v63, %v781_v62  ;;  %v2854_v62 = vpack.c.bf16 %v794_v60, %v793_v59  ;;  %v2381_v60 = vld [vmem:[%s3967_s15 + $0x7] ss:$0 sm:$0xff] }
 0x344   :  { %2764 = vmatpush1.bf16.msra.mxu0 %v2763_v7  ;;  %v783_v7 = vld [vmem:[#allocation9 + $0xd0] sm:$0xff] }
 0x345   :  { %2766 = vmatprep.subr.bf16.mxu0 %v2765_v8  ;;  %v784_v8 = vld [vmem:[#allocation9 + $0xd8] sm:$0xff] }
 0x346   :  { %v735_v54 = vpop.f32.mrb[2].mxu1  ;;  %v2835_v9 = vpack.c.bf16 %v784_v8, %v783_v7  ;;  %v958_v7 = vld [vmem:[#allocation10 + $0x10] sm:$0xff]  ;;  %v959_v8 = vld [vmem:[#allocation10 + $0x18] sm:$0xff] }
 0x347   :  { %v737_v55 = vpop.f32.mrb[3].mxu1 }
 0x348   :  { %2768 = vmatpush1.bf16.msra.mxu0 %v2767_v13  ;;  %v2837_v13 = vpack.c.bf16 %v768_v11, %v767_v10  ;;  %v960_v10 = vld [vmem:[#allocation10 + $0x20] sm:$0xff]  ;;  %v961_v11 = vld [vmem:[#allocation10 + $0x28] sm:$0xff] }
 0x349   :  { %2770 = vmatprep.subr.bf16.mxu0 %v2769_v14  ;;  %v786_v14 = vld [vmem:[#allocation9 + $0xe8] sm:$0xff] }
 0x34a   :  { %v2839_v17 = vpack.c.bf16 %v786_v14, %v785_v12  ;;  %v2864_v12 = vpack.c.bf16 %v961_v11, %v960_v10  ;;  %v963_v14 = vld [vmem:[#allocation10 + $0x38] sm:$0xff] }
 0x34c   :  { %2772 = vmatpush1.bf16.msra.mxu0 %v2771_v19  ;;  %v788_v19 = vld [vmem:[#allocation9 + $0xf8] sm:$0xff] }
 0x34d   :  { %2774 = vmatprep.subr.bf16.mxu0 %v2773_v20  ;;  %v2841_v20 = vpack.c.bf16 %v770_v16, %v769_v15  ;;  %v2843_v21 = vpack.c.bf16 %v788_v19, %v787_v18  ;;  %v964_v16 = vld [vmem:[#allocation10 + $0x40] sm:$0xff]  ;;  %v1159_v19 = vld [vmem:[#allocation13 + $0x18] sm:$0xff] }
 0x350   :  { %2776 = vmatpush1.bf16.msra.mxu0 %v2775_v25 }
 0x351   :  { %2778 = vmatprep.subr.bf16.mxu0 %v2777_v26 }
 0x354   :  { %2780 = vmatpush1.bf16.msra.mxu0 %v2779_v32  ;;  %v571_v32 = vld [vmem:[%s3967_s15 + $0x3] sm:$0x7] }
 0x355   :  { %2782 = vmatprep.subr.bf16.mxu0 %v2781_v33  ;;  %v583_v33 = vsub.s32 2, %v3838_v28  ;;  %v576_v34 = vrot.slane %v571_v32, %v3841_v29  ;;  %v580_v35 = vrot.slane %v571_v32, %v3844_v31 }
 0x357   :  { %v584_v37 = vrot.slane %v571_v32, %v583_v33 }
 0x358   :  { %2784 = vmatpush1.bf16.msra.mxu0 %v2783_v36 }
 0x359   :  { %2872 = vmatprep.subr.bf16.mxu0 %v3494_v0  ;;  %v736_v43 = vadd.f32 %v735_v54, %v584_v37 }
 0x35b   :  { %663 = vmatmul.mubr.f32.vlgmr.msra.gmra.mrb[4].mxu0 %v3824_v30  ;;  %v2823_v30 = vpack.c.bf16 %v778_v49, %v777_v48  ;;  %v744_v46 = vmin.f32 %v736_v43, 0.0  ;;  %v789_v49 = vld [vmem:[#allocation9 + $0x100] sm:$0xff]  ;;  %vm741_vm11 = vcmp.gt.f32.partialorder %v736_v43, 0.0 }
 0x35c   :  { %2665 = vmatprep.mubr.msk.f32.mxu0 %vm3495_vm0, %v3496_v1 }
 0x35d   :  { %2824 = vmatprep.subr.bf16.mxu1 %v2823_v30  ;;  %v749_v47 = vmul.f32 1.442695, %v744_v46 }
 0x35e   :  { %2826 = vmatpush3.bf16.msra.mxu1 %v2825_v53  ;;  %v2848_v53 = vpack.c.bf16 %v790_v50, %v789_v49  ;;  %v1170_v49 = vld [vmem:[#allocation13 + $0x70] sm:$0xff] }
 0x35f   :  { %2828 = vmatprep.subr.bf16.mxu1 %v2827_v58  ;;  %v2851_v58 = vpack.c.bf16 %v792_v57, %v791_v56  ;;  %v1056_v56 = vld [vmem:[%s3959_s7 + $0x18] sm:$0x3f] }
 0x362   :  { %2830 = vmatpush3.bf16.msra.mxu1 %v2829_v61 }
 0x363   :  { %2832 = vmatprep.subr.bf16.mxu1 %v2831_v3 }
 0x366   :  { %2834 = vmatpush3.bf16.msra.mxu1 %v2833_v6  ;;  %v2858_v6 = vpack.c.bf16 %v957_v5, %v956_v4  ;;  %v1156_v5 = vld [vmem:[#allocation13] sm:$0xff] }
 0x367   :  { %2836 = vmatprep.subr.bf16.mxu1 %v2835_v9  ;;  %v2861_v9 = vpack.c.bf16 %v959_v8, %v958_v7  ;;  %v1165_v7 = vld [vmem:[#allocation13 + $0x48] sm:$0xff] }
 0x368   :  { %v1169_v8 = vld [vmem:[#allocation13 + $0x68] sm:$0xff] }
 0x36a   :  { %2838 = vmatpush3.bf16.msra.mxu1 %v2837_v13  ;;  %v962_v13 = vld [vmem:[#allocation10 + $0x30] sm:$0xff] }
 0x36b   :  { %2840 = vmatprep.subr.bf16.mxu1 %v2839_v17  ;;  %v2867_v15 = vpack.c.bf16 %v963_v14, %v962_v13  ;;  %v965_v17 = vld [vmem:[#allocation10 + $0x48] sm:$0xff]  ;;  %v1164_v13 = vld [vmem:[#allocation13 + $0x40] sm:$0xff] }
 0x36c   :  { %v2870_v18 = vpack.c.bf16 %v965_v17, %v964_v16  ;;  %v1168_v14 = vld [vmem:[#allocation13 + $0x60] sm:$0xff]  ;;  %v1149_v16 = vld [vmem:[#allocation12 + $0x8] sm:$0xff] }
 0x36d   :  { %v1153_v17 = vld [vmem:[#allocation12 + $0x28] sm:$0xff] }
 0x36e   :  { %2842 = vmatpush3.bf16.msra.mxu1 %v2841_v20  ;;  %v1163_v20 = vld [vmem:[#allocation13 + $0x38] sm:$0xff] }
 0x36f   :  { %2844 = vmatprep.subr.bf16.mxu1 %v2843_v21  ;;  %v2887_v21 = vpack.c.bf16 %v1163_v20, %v1159_v19  ;;  %v2895_v19 = vpack.c.bf16 %v1153_v17, %v1149_v16  ;;  %v1148_v20 = vld [vmem:[#allocation12] sm:$0xff]  ;;  %v1859_v16 = vld [vmem:[#allocation18 + $0x40] sm:$0xff] }
 0x370   :  { %v1861_v17 = vld [vmem:[#allocation18 + $0x50] sm:$0xff] }
 0x372   :  { %2846 = vmatpush3.bf16.msra.mxu1 %v2845_v24 }
 0x373   :  { %2847 = vmatprep.subr.bf16.mxu1 %v3494_v0 }
 0x406   :  { %v3836_v25 = vpop.f32.mrb[2].mxu0 }
 0x407   :  { %v2618_v26 = vpop.f32.mrb[3].mxu0 }
 0x408   :  { %v2377_v26 = vld [vmem:[%s3967_s15 + $0x6] ss:$0 sm:$0xff] }
 0x42e   :  { %v664_v36 = vpop.f32.mrb[4].mxu0 }
 0x42f   :  { %v665_v38 = vadd.f32 %v664_v36, %v576_v34  ;;  %v666_v39 = vpop.f32.mrb[5].mxu0 }
 0x430   :  { %v667_v40 = vadd.f32 %v666_v39, %v580_v35 }
 0x431   :  { %v742_v41 = vmin.f32 %v665_v38, 0.0  ;;  %vm739_vm7 = vcmp.gt.f32.partialorder %v665_v38, 0.0 }
 0x432   :  { %v743_v42 = vmin.f32 %v667_v40, 0.0  ;;  %vm740_vm6 = vcmp.gt.f32.partialorder %v667_v40, 0.0 }
 0x433   :  { %v745_v44 = vmul.f32 1.442695, %v742_v41  ;;  %v1162_v41 = vld [vmem:[#allocation13 + $0x30] sm:$0xff] }
 0x434   :  { %v747_v45 = vmul.f32 1.442695, %v743_v42  ;;  %v1167_v42 = vld [vmem:[#allocation13 + $0x58] sm:$0xff] }
 0x435   :  { %3145 = vpow2.f32 %v745_v44 }
 0x436   :  { %3147 = vpow2.f32 %v747_v45 }
 0x437   :  { %3149 = vpow2.f32 %v749_v47 }
 0x43f   :  { %v3146_v48 = vpop.eup %3145 }
 0x440   :  { %v3148_v30 = vpop.eup %3147  ;;  %v2374_v51 = vadd.f32 -1.0, %v3146_v48  ;;  %v1166_v48 = vld [vmem:[#allocation13 + $0x50] sm:$0xff] }
 0x441   :  { %v2375_v52 = vadd.f32 -1.0, %v3148_v30  ;;  %v3150_v61 = vpop.eup %3149  ;;  %v2893_v30 = vpack.c.bf16 %v1170_v49, %v1166_v48  ;;  %v1629_v48 = vld [vmem:[#allocation16 + $0x10] sm:$0xff] }
 0x442   :  { %v754_v54 = vsel %vm739_vm7, %v665_v38, %v2374_v51  ;;  %v2376_v63 = vadd.f32 -1.0, %v3150_v61  ;;  %v2370_v38 = vld [vmem:[%s3967_s15 + $0x2] ss:$0 sm:$0xff]  ;;  %v1633_v49 = vld [vmem:[#allocation16 + $0x30] sm:$0xff] }
 0x443   :  { %v755_v55 = vsel %vm740_vm6, %v667_v40, %v2375_v52  ;;  %v507_v39 = vadd.f32 %v2370_v38, %v3836_v25  ;;  %v1158_v40 = vld [vmem:[#allocation13 + $0x10] sm:$0xff]  ;;  %v1053_v51 = vld [vmem:[%s3959_s7] sm:$0xff]  ;;  %vm1639_vm6 = vcmask 162816  }
 0x444   :  { %874 = vmatprep.mubr.f32.mxu1 %v755_v55  ;;  %v756_v3 = vsel %vm741_vm11, %v736_v43, %v2376_v63  ;;  %v1171_v43 = vld [vmem:[#allocation13 + $0x78] sm:$0xff]  ;;  %v2889_v46 = vpack.c.bf16 %v1162_v41, %v1158_v40  ;;  %v1054_v52 = vld [vmem:[%s3959_s7 + $0x8] sm:$0xff] }
 0x445   :  { %875 = vmatmul.mubr.f32.vlgmr.msra.gmra.mrb[4].mxu1 %v754_v54  ;;  %v2891_v47 = vpack.c.bf16 %v1171_v43, %v1167_v42  ;;  %v1055_v55 = vld [vmem:[%s3959_s7 + $0x10] sm:$0xff]  ;;  %v1157_v54 = vld [vmem:[#allocation13 + $0x8] sm:$0xff]  ;;  %v1627_v43 = vld [vmem:[#allocation16] sm:$0xff] }
 0x446   :  { %2849 = vmatpush3.bf16.msra.mxu1 %v2848_v53  ;;  %2631 = vmatprep.mubr.msk.f32.mxu1 %vm3495_vm0, %v3496_v1  ;;  %v2873_v53 = vpack.c.bf16 %v1054_v52, %v1053_v51  ;;  %v2876_v57 = vpack.c.bf16 %v1056_v56, %v1055_v55  ;;  %v1628_v40 = vld [vmem:[#allocation16 + $0x8] sm:$0xff]  ;;  %v1635_v51 = vld [vmem:[#allocation16 + $0x40] sm:$0xf]  ;;  %v1637_v52 = vld [vmem:[#allocation16 + $0x50] sm:$0xf] }
 0x447   :  { %2850 = vmatprep.subr.bf16.mxu1 %v3494_v0  ;;  %v1632_v41 = vld [vmem:[#allocation16 + $0x28] sm:$0xff]  ;;  %v1854_v55 = vld [vmem:[#allocation18 + $0x18] sm:$0xff] }
 0x448   :  { %2874 = vmatpush3.bf16.msra.mxu0 %v2873_v53  ;;  %v2903_v42 = vpack.c.bf16 %v1632_v41, %v1628_v40  ;;  %v1852_v53 = vld [vmem:[#allocation18 + $0x8] sm:$0xff]  ;;  %v1871_v40 = vld [vmem:[#allocation18 + $0xa0] sm:$0xff]  ;;  %v1873_v41 = vld [vmem:[#allocation18 + $0xb0] sm:$0xff] }
 0x449   :  { %2875 = vmatprep.subr.bf16.mxu0 %v3494_v0  ;;  %v2911_v56 = vpack.c.bf16 %v1854_v55, %v1852_v53 }
 0x44a   :  { %2852 = vmatpush3.bf16.msra.mxu1 %v2851_v58  ;;  %v1161_v58 = vld [vmem:[#allocation13 + $0x28] sm:$0xff] }
 0x44b   :  { %2853 = vmatprep.subr.bf16.mxu1 %v3494_v0  ;;  %v2879_v59 = vpack.c.bf16 %v1161_v58, %v1157_v54 }
 0x44c   :  { %2878 = vmatpush3.bf16.msk.msra.mxu0 %vm2877_vm2, %v2876_v57  ;;  %v2384_v57 = vld [vmem:[%s3967_s15 + $0x8] ss:$0 sm:$0xff] }
 0x44d   :  { %2880 = vmatprep.subr.bf16.mxu0 %v2879_v59 }
 0x44e   :  { %2856 = vmatpush3.bf16.msk.msra.mxu1 %vm2855_vm10, %v2854_v62 }
 0x44f   :  { %2857 = vmatprep.subr.bf16.mxu1 %v3494_v0 }
 0x451   :  { %2632 = vmatmul.mubr.msk.f32.vlgmr.msra.gmra.mrb[6].mxu1 %vm802_vm12, %v756_v3 }
 0x452   :  { %2654 = vmatprep.mubr.msk.f32.mxu1 %vm3495_vm0, %v3496_v1  ;;  %2859 = vmatpush3.bf16.msra.mxu1 %v2858_v6  ;;  %v1160_v6 = vld [vmem:[#allocation13 + $0x20] sm:$0xff] }
 0x453   :  { %2860 = vmatprep.subr.bf16.mxu1 %v3494_v0  ;;  %v2881_v11 = vpack.c.bf16 %v1160_v6, %v1156_v5 }
 0x456   :  { %2862 = vmatpush3.bf16.msra.mxu1 %v2861_v9 }
 0x457   :  { %2863 = vmatprep.subr.bf16.mxu1 %v3494_v0 }
 0x45a   :  { %2865 = vmatpush3.bf16.msra.mxu1 %v2864_v12  ;;  %v2883_v12 = vpack.c.bf16 %v1169_v8, %v1165_v7 }
 0x45b   :  { %2866 = vmatprep.subr.bf16.mxu1 %v3494_v0 }
 0x45e   :  { %2868 = vmatpush3.bf16.msra.mxu1 %v2867_v15 }
 0x45f   :  { %2869 = vmatprep.subr.bf16.mxu1 %v3494_v0 }
 0x462   :  { %2871 = vmatpush3.bf16.msra.mxu1 %v2870_v18  ;;  %v2885_v18 = vpack.c.bf16 %v1168_v14, %v1164_v13  ;;  %v1862_v13 = vld [vmem:[#allocation18 + $0x58] sm:$0xff] }
 0x463   :  { %2888 = vmatprep.subr.bf16.mxu1 %v2887_v21  ;;  %v1152_v21 = vld [vmem:[#allocation12 + $0x20] sm:$0xff] }
 0x518   :  { %v2476_v22 = vpop.f32.mrb[4].mxu1 }
 0x519   :  { %v2477_v23 = vpop.f32.mrb[5].mxu1 }
 0x51a   :  { %v2478_v24 = vadd.f32 %v2477_v23, %v2476_v22  ;;  %v2897_v22 = vpack.c.bf16 %v1152_v21, %v1148_v20  ;;  %v1151_v23 = vld [vmem:[#allocation12 + $0x18] sm:$0xff]  ;;  %v2921_v20 = vpack.c.bf16 %v1861_v17, %v1859_v16  ;;  %v1902_v16 = vld [vmem:[#allocation18 + $0x198] sm:$0xff] }
 0x51c   :  { %v877_v27 = vadd.f32 %v2478_v24, %v2377_v26  ;;  %v1155_v24 = vld [vmem:[#allocation12 + $0x38] sm:$0xff] }
 0x51d   :  { %v2899_v26 = vpack.c.bf16 %v1155_v24, %v1151_v23  ;;  %v1865_v23 = vld [vmem:[#allocation18 + $0x70] sm:$0xff]  ;;  %v1868_v24 = vld [vmem:[#allocation18 + $0x88] sm:$0xff] }
 0x524   :  { %v946_v32 = vpop.f32.mrb[6].mxu1 }
 0x525   :  { %v947_v34 = vadd.f32 %v946_v32, %v877_v27  ;;  %v2633_v35 = vpop.f32.mrb[7].mxu1  ;;  %v1150_v27 = vld [vmem:[#allocation12 + $0x10] sm:$0xff] }
 0x526   :  { %v1154_v32 = vld [vmem:[#allocation12 + $0x30] sm:$0xff]  ;;  %v1462_v35 = vld [vmem:[#allocation15] sm:$0xff] }
 0x527   :  { %v951_v36 = vmin.f32 %v947_v34, 0.0  ;;  %vm950_vm14 = vcmp.gt.f32.partialorder %v947_v34, 0.0 }
 0x529   :  { %v952_v37 = vmul.f32 1.442695, %v951_v36  ;;  %v1463_v36 = vld [vmem:[#allocation15 + $0x8] sm:$0xff] }
 0x52a   :  { %v1469_v38 = vcombine.high %v1463_v36, %v1463_v36 }
 0x52b   :  { %3151 = vpow2.f32 %v952_v37  ;;  %v1468_v37 = vcombine.high %v1462_v35, %v1462_v35 }
 0x52c   :  { %3153 = vtanh.f32 %v507_v39  ;;  %v1465_v39 = vpop.permute.xlu1 %1464 }
 0x535   :  { %v3152_v44 = vpop.eup %3151 }
 0x536   :  { %v2380_v45 = vadd.f32 -1.0, %v3152_v44  ;;  %v3154_v25 = vpop.eup %3153  ;;  %v1631_v44 = vld [vmem:[#allocation16 + $0x20] sm:$0xff] }
 0x538   :  { %v955_v50 = vsel %vm950_vm14, %v947_v34, %v2380_v45  ;;  %v2901_v34 = vpack.c.bf16 %v1154_v32, %v1150_v27  ;;  %v1634_v45 = vld [vmem:[#allocation16 + $0x38] sm:$0xff] }
 0x539   :  { %2655 = vmatmul.mubr.msk.f32.vlgmr.msra.gmra.mrb[8].mxu1 %vm973_vm13, %v955_v50  ;;  %v2909_v50 = vpack.c.bf16 %v1633_v49, %v1629_v48  ;;  %v1882_v48 = vld [vmem:[#allocation18 + $0xf8] sm:$0xff] }
 0x53a   :  { %2890 = vmatpush1.bf16.msra.mxu1 %v2889_v46  ;;  %1310 = vmatprep.mubr.f32.mxu1 %v3496_v1  ;;  %v2905_v46 = vpack.c.bf16 %v1631_v44, %v1627_v43  ;;  %v2933_v43 = vpack.c.bf16 %v1873_v41, %v1871_v40 }
 0x53b   :  { %2892 = vmatprep.subr.bf16.mxu1 %v2891_v47 }
 0x53e   :  { %2894 = vmatpush1.bf16.msra.mxu1 %v2893_v30  ;;  %v1636_v30 = vld [vmem:[#allocation16 + $0x48] sm:$0xf] }
 0x53f   :  { %2900 = vmatprep.subr.bf16.mxu1 %v2899_v26  ;;  %v1870_v26 = vld [vmem:[#allocation18 + $0x98] sm:$0xff] }
 0x540   :  { %v2927_v32 = vpack.c.bf16 %v1870_v26, %v1868_v24  ;;  %v1903_v24 = vld [vmem:[#allocation18 + $0x1a0] sm:$0xff]  ;;  %v1905_v26 = vld [vmem:[#allocation18 + $0x1b0] sm:$0xff] }
 0x541   :  { %2389 = vmatmul.mubr.msk.f32.vlgmr.msra.gmra.mrb[10].mxu1 %vm243_vm1, %v3154_v25 }
 0x542   :  { %1455 = vmatprep.mubr.f32.mxu1 %v3496_v1  ;;  %2902 = vmatpush1.bf16.msra.mxu1 %v2901_v34  ;;  %v1867_v34 = vld [vmem:[#allocation18 + $0x80] sm:$0xff] }
 0x543   :  { %2395 = vmatprep.subr.msk.mxu1 %vm806_vm8, %v1469_v38 }
 0x549   :  { %2391 = vmatmul.mubr.msk.f32.vlgmr.msra.gmra.mrb[10].mxu1 %vm1317_vm5, %v3788_v2 }
 0x54a   :  { %1616 = vmatprep.mubr.f32.mxu1 %v3496_v1  ;;  %2396 = vmatpush1.msk.msra.mxu1 %vm806_vm8, %v1463_v36  ;;  %v1872_v36 = vld [vmem:[#allocation18 + $0xa8] sm:$0xff] }
 0x60c   :  { %v1043_v61 = vpop.f32.mrb[8].mxu1 }
 0x60d   :  { %v1044_v62 = vadd.f32 %v2381_v60, %v1043_v61  ;;  %v2656_v63 = vpop.f32.mrb[9].mxu1 }
 0x60e   :  { %v1853_v63 = vld [vmem:[#allocation18 + $0x10] sm:$0xff] }
 0x60f   :  { %v1048_v3 = vmin.f32 %v1044_v62, 0.0  ;;  %vm1047_vm4 = vcmp.gt.f32.partialorder %v1044_v62, 0.0 }
 0x611   :  { %v1049_v4 = vmul.f32 1.442695, %v1048_v3  ;;  %v1856_v3 = vld [vmem:[#allocation18 + $0x28] sm:$0xff] }
 0x613   :  { %3155 = vpow2.f32 %v1049_v4  ;;  %v1858_v4 = vld [vmem:[#allocation18 + $0x38] sm:$0xff] }
 0x614   :  { %v2915_v8 = vpack.c.bf16 %v1858_v4, %v1856_v3  ;;  %v1894_v3 = vld [vmem:[#allocation18 + $0x158] sm:$0xff] }
 0x61d   :  { %v3156_v9 = vpop.eup %3155 }
 0x61e   :  { %v2383_v10 = vadd.f32 -1.0, %v3156_v9  ;;  %v1855_v9 = vld [vmem:[#allocation18 + $0x20] sm:$0xff] }
 0x620   :  { %v1052_v15 = vsel %vm1047_vm4, %v1044_v62, %v2383_v10  ;;  %v1851_v62 = vld [vmem:[#allocation18] sm:$0xff]  ;;  %v1857_v10 = vld [vmem:[#allocation18 + $0x30] sm:$0xff] }
 0x621   :  { %2666 = vmatmul.mubr.msk.f32.vlgmr.msra.gmra.mrb[6].mxu0 %vm1064_vm3, %v1052_v15  ;;  %v2913_v7 = vpack.c.bf16 %v1853_v63, %v1851_v62  ;;  %v2917_v14 = vpack.c.bf16 %v1857_v10, %v1855_v9  ;;  %v1889_v62 = vld [vmem:[#allocation18 + $0x130] sm:$0xff]  ;;  %v1892_v63 = vld [vmem:[#allocation18 + $0x148] sm:$0xff]  ;;  %v1898_v10 = vld [vmem:[#allocation18 + $0x178] sm:$0xff] }
 0x622   :  { %2882 = vmatpush1.bf16.msra.mxu0 %v2881_v11  ;;  %1239 = vmatprep.mubr.f32.mxu0 %v3496_v1  ;;  %v1896_v9 = vld [vmem:[#allocation18 + $0x168] sm:$0xff] }
 0x623   :  { %2884 = vmatprep.subr.bf16.mxu0 %v2883_v12  ;;  %v1860_v12 = vld [vmem:[#allocation18 + $0x48] sm:$0xff] }
 0x624   :  { %v2919_v15 = vpack.c.bf16 %v1862_v13, %v1860_v12  ;;  %v1895_v12 = vld [vmem:[#allocation18 + $0x160] sm:$0xff]  ;;  %v1897_v13 = vld [vmem:[#allocation18 + $0x170] sm:$0xff] }
 0x626   :  { %2886 = vmatpush1.bf16.msra.mxu0 %v2885_v18  ;;  %v1864_v18 = vld [vmem:[#allocation18 + $0x68] sm:$0xff] }
 0x627   :  { %2896 = vmatprep.subr.bf16.mxu0 %v2895_v19  ;;  %v1866_v19 = vld [vmem:[#allocation18 + $0x78] sm:$0xff] }
 0x628   :  { %v2923_v21 = vpack.c.bf16 %v1866_v19, %v1864_v18  ;;  %v1899_v18 = vld [vmem:[#allocation18 + $0x180] sm:$0xff]  ;;  %v1901_v19 = vld [vmem:[#allocation18 + $0x190] sm:$0xff] }
 0x629   :  { %2388 = vmatmul.mubr.msk.f32.vlgmr.msra.gmra.mrb[8].mxu0 %vm243_vm1, %v3154_v25  ;;  %vm1470_vm1 = vcmask 31744   ;;  %v1638_v25 = vld [vmem:[#allocation16 + $0x58] sm:$0xf] }
 0x62a   :  { %2898 = vmatpush1.bf16.msra.mxu0 %v2897_v22  ;;  %1384 = vmatprep.mubr.f32.mxu0 %v3496_v1  ;;  %v1863_v22 = vld [vmem:[#allocation18 + $0x60] sm:$0xff] }
 0x62b   :  { %2392 = vmatprep.subr.msk.mxu0 %vm806_vm8, %v1468_v37  ;;  %2397 = vmatmul.mubr.msk.f32.vlgmr.msra.gmra.mrb[10].mxu1 %vm1470_vm1, %v1465_v39  ;;  %v2925_v27 = vpack.c.bf16 %v1865_v23, %v1863_v22  ;;  %v1874_v37 = vld [vmem:[#allocation18 + $0xb8] sm:$0xff] }
 0x62c   :  { %1790 = vmatprep.mubr.f32.mxu1 %v3496_v1  ;;  %v1906_v22 = vld [vmem:[#allocation18 + $0x1b8] sm:$0xff] }
 0x631   :  { %2390 = vmatmul.mubr.msk.f32.vlgmr.msra.gmra.mrb[8].mxu0 %vm1317_vm5, %v3788_v2  ;;  %v1630_v2 = vld [vmem:[#allocation16 + $0x18] sm:$0xff] }
 0x632   :  { %1545 = vmatprep.mubr.f32.mxu0 %v3496_v1  ;;  %2393 = vmatpush1.msk.msra.mxu0 %vm806_vm8, %v1462_v35  ;;  %v2907_v47 = vpack.c.bf16 %v1634_v45, %v1630_v2  ;;  %v1869_v35 = vld [vmem:[#allocation18 + $0x90] sm:$0xff]  ;;  %v1876_v2 = vld [vmem:[#allocation18 + $0xc8] sm:$0xff]  ;;  %v1875_v45 = vld [vmem:[#allocation18 + $0xc0] sm:$0xff] }
 0x633   :  { %2904 = vmatprep.subr.bf16.mxu0 %v2903_v42  ;;  %v2929_v38 = vpack.c.bf16 %v1869_v35, %v1867_v34  ;;  %v1878_v42 = vld [vmem:[#allocation18 + $0xd8] sm:$0xff]  ;;  %v1907_v35 = vld [vmem:[#allocation18 + $0x1c0] sm:$0xff] }
 0x634   :  { %2908 = vmatprep.subr.bf16.mxu1 %v2907_v47  ;;  %v2935_v44 = vpack.c.bf16 %v1878_v42, %v1876_v2  ;;  %v1880_v47 = vld [vmem:[#allocation18 + $0xe8] sm:$0xff]  ;;  %v1910_v34 = vld [vmem:[#allocation18 + $0x1d8] sm:$0xff]  ;;  %v1911_v2 = vld [vmem:[#allocation18 + $0x1e0] sm:$0xff] }
 0x635   :  { %2910 = vmatpush1.bf16.msra.mxu1 %v2909_v50  ;;  %v2939_v50 = vpack.c.bf16 %v1882_v48, %v1880_v47  ;;  %v1913_v42 = vld [vmem:[#allocation18 + $0x1f0] sm:$0xff]  ;;  %v2161_v47 = vld [vmem:[#allocation19 + $0x80] sm:$0xff]  ;;  %v2162_v48 = vld [vmem:[#allocation19 + $0x88] sm:$0xff] }
 0x636   :  { %2401 = vmatprep.subr.msk.mxu1 %vm806_vm8, %v1638_v25  ;;  %v1881_v25 = vld [vmem:[#allocation18 + $0xf0] sm:$0xff] }
 0x639   :  { %2394 = vmatmul.mubr.msk.f32.vlgmr.msra.gmra.mrb[8].mxu0 %vm1470_vm1, %v1465_v39  ;;  %2402 = vmatpush1.msk.msra.mxu1 %vm806_vm8, %v1637_v52  ;;  %v2931_v39 = vpack.c.bf16 %v1874_v37, %v1872_v36  ;;  %v1886_v52 = vld [vmem:[#allocation18 + $0x118] sm:$0xff]  ;;  %v1909_v36 = vld [vmem:[#allocation18 + $0x1d0] sm:$0xff] }
 0x63a   :  { %1719 = vmatprep.mubr.f32.mxu0 %v3496_v1  ;;  %2906 = vmatpush1.bf16.msra.mxu0 %v2905_v46  ;;  %v1877_v46 = vld [vmem:[#allocation18 + $0xd0] sm:$0xff]  ;;  %v2969_v40 = vpack.c.bf16 %v1909_v36, %v1907_v35  ;;  %v1919_v36 = vld [vmem:[#allocation18 + $0x220] sm:$0xff] }
 0x63b   :  { %2398 = vmatprep.subr.msk.mxu0 %vm806_vm8, %v1636_v30  ;;  %v2937_v49 = vpack.c.bf16 %v1877_v46, %v1875_v45  ;;  %v1879_v30 = vld [vmem:[#allocation18 + $0xe0] sm:$0xff]  ;;  %v1918_v45 = vld [vmem:[#allocation18 + $0x218] sm:$0xff] }
 0x63c   :  { %v2941_v53 = vpack.c.bf16 %v1881_v25, %v1879_v30  ;;  %v2146_v30 = vld [vmem:[#allocation19 + $0x8] sm:$0xff]  ;;  %v2163_v25 = vld [vmem:[#allocation19 + $0x90] sm:$0xff] }
 0x63e   :  { %2399 = vmatpush1.msk.msra.mxu0 %vm806_vm8, %v1635_v51  ;;  %v1884_v51 = vld [vmem:[#allocation18 + $0x108] sm:$0xff] }
 0x63f   :  { %2912 = vmatprep.subr.bf16.mxu0 %v2911_v56  ;;  %v2943_v55 = vpack.c.bf16 %v1886_v52, %v1884_v51  ;;  %v1883_v56 = vld [vmem:[#allocation18 + $0x100] sm:$0xff]  ;;  %v2164_v51 = vld [vmem:[#allocation19 + $0x98] sm:$0xff] }
 0x6f4   :  { %v1138_v54 = vpop.f32.mrb[6].mxu0 }
 0x6f5   :  { %v1139_v58 = vadd.f32 %v2384_v57, %v1138_v54  ;;  %v2667_v59 = vpop.f32.mrb[7].mxu0  ;;  %v1885_v57 = vld [vmem:[#allocation18 + $0x110] sm:$0xff]  ;;  %v1888_v54 = vld [vmem:[#allocation18 + $0x128] sm:$0xff] }
 0x6f6   :  { %v2945_v59 = vpack.c.bf16 %v1885_v57, %v1883_v56  ;;  %v2148_v56 = vld [vmem:[#allocation19 + $0x18] sm:$0xff]  ;;  %v2165_v57 = vld [vmem:[#allocation19 + $0xa0] sm:$0xff] }
 0x6f7   :  { %v1143_v60 = vmin.f32 %v1139_v58, 0.0  ;;  %vm1142_vm7 = vcmp.gt.f32.partialorder %v1139_v58, 0.0 }
 0x6f9   :  { %v1144_v61 = vmul.f32 1.442695, %v1143_v60 }
 0x6fb   :  { %3157 = vpow2.f32 %v1144_v61  ;;  %v1887_v61 = vld [vmem:[#allocation18 + $0x120] sm:$0xff] }
 0x6fc   :  { %v2949_v4 = vpack.c.bf16 %v1889_v62, %v1887_v61  ;;  %v1817_v61 = vsub.s32 3, %v3838_v28 }
 0x705   :  { %v3158_v5 = vpop.eup %3157 }
 0x706   :  { %v2387_v6 = vadd.f32 -1.0, %v3158_v5  ;;  %v2951_v5 = vpack.c.bf16 %v1894_v3, %v1892_v63 }
 0x708   :  { %v1147_v11 = vsel %vm1142_vm7, %v1139_v58, %v2387_v6  ;;  %v1890_v58 = vld [vmem:[#allocation18 + $0x138] sm:$0xff]  ;;  %v1891_v6 = vld [vmem:[#allocation18 + $0x140] sm:$0xff] }
 0x709   :  { %2400 = vmatmul.mubr.msk.f32.vlgmr.msra.gmra.mrb[8].mxu0 %vm1639_vm6, %v1147_v11  ;;  %2403 = vmatmul.mubr.msk.f32.vlgmr.msra.gmra.mrb[10].mxu1 %vm1639_vm6, %v1147_v11  ;;  %v2947_v60 = vpack.c.bf16 %v1890_v58, %v1888_v54  ;;  %v2955_v11 = vpack.c.bf16 %v1898_v10, %v1896_v9  ;;  %v2166_v54 = vld [vmem:[#allocation19 + $0xa8] sm:$0xff] }
 0x70a   :  { %2914 = vmatpush1.bf16.msra.mxu0 %v2913_v7  ;;  %v1893_v7 = vld [vmem:[#allocation18 + $0x150] sm:$0xff] }
 0x70b   :  { %2916 = vmatprep.subr.bf16.mxu0 %v2915_v8  ;;  %v2953_v8 = vpack.c.bf16 %v1893_v7, %v1891_v6 }
 0x70e   :  { %2918 = vmatpush1.bf16.msra.mxu0 %v2917_v14  ;;  %v2957_v14 = vpack.c.bf16 %v1897_v13, %v1895_v12 }
 0x70f   :  { %2920 = vmatprep.subr.bf16.mxu0 %v2919_v15  ;;  %v1900_v15 = vld [vmem:[#allocation18 + $0x188] sm:$0xff] }
 0x710   :  { %v2959_v17 = vpack.c.bf16 %v1902_v16, %v1900_v15 }
 0x712   :  { %2922 = vmatpush1.bf16.msra.mxu0 %v2921_v20  ;;  %v2961_v20 = vpack.c.bf16 %v1901_v19, %v1899_v18  ;;  %v1917_v19 = vld [vmem:[#allocation18 + $0x210] sm:$0xff] }
 0x713   :  { %2924 = vmatprep.subr.bf16.mxu0 %v2923_v21  ;;  %v1904_v21 = vld [vmem:[#allocation18 + $0x1a8] sm:$0xff] }
 0x714   :  { %v2963_v23 = vpack.c.bf16 %v1906_v22, %v1904_v21  ;;  %v1920_v22 = vld [vmem:[#allocation18 + $0x228] sm:$0xff] }
 0x716   :  { %2926 = vmatpush1.bf16.msra.mxu0 %v2925_v27  ;;  %v1908_v27 = vld [vmem:[#allocation18 + $0x1c8] sm:$0xff] }
 0x717   :  { %2928 = vmatprep.subr.bf16.mxu0 %v2927_v32  ;;  %v2965_v32 = vpack.c.bf16 %v1905_v26, %v1903_v24  ;;  %v2967_v37 = vpack.c.bf16 %v1910_v34, %v1908_v27 }
 0x71a   :  { %2930 = vmatpush1.bf16.msra.mxu0 %v2929_v38  ;;  %v1912_v38 = vld [vmem:[#allocation18 + $0x1e8] sm:$0xff] }
 0x71b   :  { %2932 = vmatprep.subr.bf16.mxu0 %v2931_v39  ;;  %v1914_v39 = vld [vmem:[#allocation18 + $0x1f8] sm:$0xff] }
 0x71c   :  { %v2971_v41 = vpack.c.bf16 %v1914_v39, %v1912_v38  ;;  %v1924_v39 = vld [vmem:[#allocation18 + $0x248] sm:$0xff] }
 0x71e   :  { %2934 = vmatpush1.bf16.msra.mxu0 %v2933_v43  ;;  %v2973_v43 = vpack.c.bf16 %v1913_v42, %v1911_v2 }
 0x71f   :  { %2936 = vmatprep.subr.bf16.mxu0 %v2935_v44  ;;  %v1916_v44 = vld [vmem:[#allocation18 + $0x208] sm:$0xff] }
 0x720   :  { %v2975_v46 = vpack.c.bf16 %v1918_v45, %v1916_v44  ;;  %v1925_v44 = vld [vmem:[#allocation18 + $0x250] sm:$0xff]  ;;  %v1928_v45 = vld [vmem:[#allocation18 + $0x268] sm:$0xff] }
 0x722   :  { %2938 = vmatpush1.bf16.msra.mxu0 %v2937_v49  ;;  %v2145_v49 = vld [vmem:[#allocation19] sm:$0xff] }
 0x723   :  { %2940 = vmatprep.subr.bf16.mxu0 %v2939_v50  ;;  %v3039_v50 = vpack.c.bf16 %v2162_v48, %v2161_v47  ;;  %v3041_v52 = vpack.c.bf16 %v2146_v30, %v2145_v49  ;;  %v1927_v49 = vld [vmem:[#allocation18 + $0x260] sm:$0xff]  ;;  %v1932_v30 = vld [vmem:[#allocation18 + $0x288] sm:$0xff] }
 0x725   :  { %3040 = vmatprep.subr.bf16.mxu1 %v3039_v50  ;;  %v1929_v50 = vld [vmem:[#allocation18 + $0x270] sm:$0xff] }
 0x726   :  { %2942 = vmatpush1.bf16.msra.mxu0 %v2941_v53  ;;  %v3043_v53 = vpack.c.bf16 %v2164_v51, %v2163_v25  ;;  %3042 = vmatpush3.bf16.msra.mxu1 %v3041_v52  ;;  %v1934_v25 = vld [vmem:[#allocation18 + $0x298] sm:$0xff]  ;;  %v2989_v51 = vpack.c.bf16 %v1929_v50, %v1927_v49 }
 0x727   :  { %2944 = vmatprep.subr.bf16.mxu0 %v2943_v55  ;;  %v2147_v55 = vld [vmem:[#allocation19 + $0x10] sm:$0xff]  ;;  %v2991_v52 = vpack.c.bf16 %v1934_v25, %v1932_v30  ;;  %v1970_v49 = vld [vmem:[#allocation18 + $0x3b8] sm:$0xff]  ;;  %v1967_v25 = vld [vmem:[#allocation18 + $0x3a0] sm:$0xff] }
 0x728   :  { %v3045_v58 = vpack.c.bf16 %v2148_v56, %v2147_v55  ;;  %3044 = vmatprep.subr.bf16.mxu1 %v3043_v53  ;;  %v1931_v53 = vld [vmem:[#allocation18 + $0x280] sm:$0xff]  ;;  %v1933_v55 = vld [vmem:[#allocation18 + $0x290] sm:$0xff]  ;;  %v1936_v56 = vld [vmem:[#allocation18 + $0x2a8] sm:$0xff] }
 0x72a   :  { %2946 = vmatpush1.bf16.msra.mxu0 %v2945_v59  ;;  %v3047_v59 = vpack.c.bf16 %v2166_v54, %v2165_v57  ;;  %3046 = vmatpush3.bf16.msra.mxu1 %v3045_v58  ;;  %v1938_v57 = vld [vmem:[#allocation18 + $0x2b8] sm:$0xff]  ;;  %v2993_v54 = vpack.c.bf16 %v1933_v55, %v1931_v53 }
 0x72b   :  { %2948 = vmatprep.subr.bf16.mxu0 %v2947_v60  ;;  %v1801_v60 = vld [vmem:[%s3967_s15 + $0x9] sm:$0xf]  ;;  %v2995_v58 = vpack.c.bf16 %v1938_v57, %v1936_v56  ;;  %v1974_v53 = vld [vmem:[#allocation18 + $0x3d8] sm:$0xff] }
 0x72c   :  { %3048 = vmatprep.subr.bf16.mxu1 %v3047_v59  ;;  %v1806_v62 = vrot.slane %v1801_v60, %v3841_v29  ;;  %v1814_v63 = vrot.slane %v1801_v60, %v583_v33  ;;  %v1810_v3 = vrot.slane %v1801_v60, %v3844_v31  ;;  %v1915_v33 = vld [vmem:[#allocation18 + $0x200] sm:$0xff] }
 0x72d   :  { %v2977_v27 = vpack.c.bf16 %v1917_v19, %v1915_v33  ;;  %v1935_v59 = vld [vmem:[#allocation18 + $0x2a0] sm:$0xff]  ;;  %v1954_v33 = vld [vmem:[#allocation18 + $0x338] sm:$0xff] }
 0x72e   :  { %2950 = vmatpush1.bf16.msra.mxu0 %v2949_v4  ;;  %v1818_v4 = vrot.slane %v1801_v60, %v1817_v61  ;;  %v1937_v60 = vld [vmem:[#allocation18 + $0x2b0] sm:$0xff]  ;;  %v1940_v61 = vld [vmem:[#allocation18 + $0x2c8] sm:$0xff]  ;;  %v1971_v57 = vld [vmem:[#allocation18 + $0x3c0] sm:$0xff] }
 0x72f   :  { %2952 = vmatprep.subr.bf16.mxu0 %v2951_v5 }
 0x732   :  { %2954 = vmatpush1.bf16.msra.mxu0 %v2953_v8 }
 0x733   :  { %2956 = vmatprep.subr.bf16.mxu0 %v2955_v11 }
 0x736   :  { %2958 = vmatpush1.bf16.msra.mxu0 %v2957_v14 }
 0x737   :  { %2960 = vmatprep.subr.bf16.mxu0 %v2959_v17 }
 0x73a   :  { %2962 = vmatpush1.bf16.msra.mxu0 %v2961_v20 }
 0x73b   :  { %2964 = vmatprep.subr.bf16.mxu0 %v2963_v23  ;;  %v1922_v23 = vld [vmem:[#allocation18 + $0x238] sm:$0xff] }
 0x73c   :  { %v2979_v35 = vpack.c.bf16 %v1922_v23, %v1920_v22  ;;  %v1953_v22 = vld [vmem:[#allocation18 + $0x330] sm:$0xff]  ;;  %v1956_v23 = vld [vmem:[#allocation18 + $0x348] sm:$0xff] }
 0x73e   :  { %2966 = vmatpush1.bf16.msra.mxu0 %v2965_v32 }
 0x73f   :  { %2968 = vmatprep.subr.bf16.mxu0 %v2967_v37  ;;  %v1921_v37 = vld [vmem:[#allocation18 + $0x230] sm:$0xff] }
 0x740   :  { %v2981_v2 = vpack.c.bf16 %v1921_v37, %v1919_v36  ;;  %v1962_v36 = vld [vmem:[#allocation18 + $0x378] sm:$0xff] }
 0x742   :  { %2970 = vmatpush1.bf16.msra.mxu0 %v2969_v40  ;;  %v1926_v40 = vld [vmem:[#allocation18 + $0x258] sm:$0xff] }
 0x743   :  { %2972 = vmatprep.subr.bf16.mxu0 %v2971_v41  ;;  %v2983_v42 = vpack.c.bf16 %v1926_v40, %v1924_v39  ;;  %v1959_v40 = vld [vmem:[#allocation18 + $0x360] sm:$0xff] }
 0x746   :  { %2974 = vmatpush1.bf16.msra.mxu0 %v2973_v43  ;;  %v1923_v43 = vld [vmem:[#allocation18 + $0x240] sm:$0xff] }
 0x747   :  { %2976 = vmatprep.subr.bf16.mxu0 %v2975_v46  ;;  %v1930_v46 = vld [vmem:[#allocation18 + $0x278] sm:$0xff]  ;;  %v2985_v47 = vpack.c.bf16 %v1925_v44, %v1923_v43 }
 0x748   :  { %v2987_v48 = vpack.c.bf16 %v1930_v46, %v1928_v45  ;;  %v1963_v46 = vld [vmem:[#allocation18 + $0x380] sm:$0xff] }
 0x7dc   :  { %v1721_v5 = vpop.f32.mrb[8].mxu0  ;;  %v1792_v6 = vpop.f32.mrb[10].mxu1 }
 0x7dd   :  { %v1823_v7 = vadd.f32 %v1806_v62, %v1721_v5  ;;  %v3923_v8 = vadd.f32 %v1814_v63, %v1792_v6  ;;  %v1723_v9 = vpop.f32.mrb[9].mxu0  ;;  %v1794_v10 = vpop.f32.mrb[11].mxu1  ;;  %v1942_v62 = vld [vmem:[#allocation18 + $0x2d8] sm:$0xff]  ;;  %v2997_v63 = vpack.c.bf16 %v1937_v60, %v1935_v59  ;;  %v1941_v5 = vld [vmem:[#allocation18 + $0x2d0] sm:$0xff]  ;;  %v1944_v6 = vld [vmem:[#allocation18 + $0x2e8] sm:$0xff] }
 0x7de   :  { %v1824_v11 = vadd.f32 %v1810_v3, %v1723_v9  ;;  %v1826_v12 = vadd.f32 %v1818_v4, %v1794_v10  ;;  %v2999_v3 = vpack.c.bf16 %v1942_v62, %v1940_v61  ;;  %v1939_v4 = vld [vmem:[#allocation18 + $0x2c0] sm:$0xff]  ;;  %v1978_v59 = vld [vmem:[#allocation18 + $0x3f8] sm:$0xff] }
 0x7df   :  { %v1831_v13 = vmin.f32 %v1823_v7, 0.0  ;;  %vm1827_vm9 = vcmp.gt.f32.partialorder %v1823_v7, 0.0  ;;  %v3001_v9 = vpack.c.bf16 %v1941_v5, %v1939_v4  ;;  %v1975_v62 = vld [vmem:[#allocation18 + $0x3e0] sm:$0xff]  ;;  %vm1829_vm11 = vcmp.gt.f32.partialorder %v3923_v8, 0.0 }
 0x7e0   :  { %v1832_v14 = vmin.f32 %v1824_v11, 0.0  ;;  %v1834_v15 = vmin.f32 %v1826_v12, 0.0  ;;  %vm1828_vm8 = vcmp.gt.f32.partialorder %v1824_v11, 0.0  ;;  %vm1830_vm10 = vcmp.gt.f32.partialorder %v1826_v12, 0.0 }
 0x7e1   :  { %v1835_v16 = vmul.f32 1.442695, %v1831_v13  ;;  %v1948_v13 = vld [vmem:[#allocation18 + $0x308] sm:$0xff] }
 0x7e2   :  { %v1837_v17 = vmul.f32 1.442695, %v1832_v14  ;;  %v1841_v18 = vmul.f32 1.442695, %v1834_v15  ;;  %v1950_v14 = vld [vmem:[#allocation18 + $0x318] sm:$0xff] }
 0x7e3   :  { %3159 = vpow2.f32 %v1835_v16  ;;  %v3007_v16 = vpack.c.bf16 %v1950_v14, %v1948_v13  ;;  %v2151_v14 = vld [vmem:[#allocation19 + $0x30] sm:$0xff] }
 0x7e4   :  { %3161 = vpow2.f32 %v1837_v17  ;;  %v1947_v17 = vld [vmem:[#allocation18 + $0x300] sm:$0xff] }
 0x7e5   :  { %3163 = vpow2.f32 %v1841_v18  ;;  %v1949_v18 = vld [vmem:[#allocation18 + $0x310] sm:$0xff] }
 0x7e6   :  { %v3009_v19 = vpack.c.bf16 %v1949_v18, %v1947_v17  ;;  %v2169_v17 = vld [vmem:[#allocation19 + $0xc0] sm:$0xff]  ;;  %v2170_v18 = vld [vmem:[#allocation19 + $0xc8] sm:$0xff] }
 0x7ed   :  { %v3160_v28 = vpop.eup %3159 }
 0x7ee   :  { %v3162_v20 = vpop.eup %3161  ;;  %v2404_v21 = vadd.f32 -1.0, %v3160_v28  ;;  %v1952_v28 = vld [vmem:[#allocation18 + $0x328] sm:$0xff] }
 0x7ef   :  { %v3164_v24 = vpop.eup %3163  ;;  %v2405_v26 = vadd.f32 -1.0, %v3162_v20  ;;  %v3011_v20 = vpack.c.bf16 %v1954_v33, %v1952_v28  ;;  %v3055_v28 = vpack.c.bf16 %v2170_v18, %v2169_v17  ;;  %v2153_v33 = vld [vmem:[#allocation19 + $0x40] sm:$0xff]  ;;  %v2275_v17 = vld [vmem:[#allocation21 + $0x78] sm:$0xff] }
 0x7f0   :  { %v2407_v32 = vadd.f32 -1.0, %v3164_v24  ;;  %v1847_v38 = vsel %vm1827_vm9, %v1823_v7, %v2404_v21  ;;  %v1946_v7 = vld [vmem:[#allocation18 + $0x2f8] sm:$0xff]  ;;  %v1951_v21 = vld [vmem:[#allocation18 + $0x320] sm:$0xff] }
 0x7f1   :  { %v1848_v34 = vsel %vm1828_vm8, %v1824_v11, %v2405_v26  ;;  %v3003_v10 = vpack.c.bf16 %v1946_v7, %v1944_v6  ;;  %v1943_v11 = vld [vmem:[#allocation18 + $0x2e0] sm:$0xff]  ;;  %v1958_v24 = vld [vmem:[#allocation18 + $0x358] sm:$0xff]  ;;  %v3013_v26 = vpack.c.bf16 %v1953_v22, %v1951_v21  ;;  %v2155_v22 = vld [vmem:[#allocation19 + $0x50] sm:$0xff] }
 0x7f2   :  { %2055 = vmatprep.mubr.f32.mxu0 %v1848_v34  ;;  %v1850_v41 = vsel %vm1830_vm10, %v1826_v12, %v2407_v32  ;;  %v1945_v12 = vld [vmem:[#allocation18 + $0x2f0] sm:$0xff]  ;;  %v1955_v32 = vld [vmem:[#allocation18 + $0x340] sm:$0xff]  ;;  %v2172_v21 = vld [vmem:[#allocation19 + $0xd8] sm:$0xff] }
 0x7f3   :  { %2056 = vmatmul.mubr.f32.vlgmr.msra.gmra.mrb[10].mxu0 %v1847_v38  ;;  %v3005_v15 = vpack.c.bf16 %v1945_v12, %v1943_v11  ;;  %v1957_v34 = vld [vmem:[#allocation18 + $0x350] sm:$0xff]  ;;  %v1833_v38 = vmin.f32 %v3923_v8, 0.0  ;;  %v2149_v7 = vld [vmem:[#allocation19 + $0x20] sm:$0xff]  ;;  %v2168_v12 = vld [vmem:[#allocation19 + $0xb8] sm:$0xff] }
 0x7f4   :  { %2978 = vmatpush1.bf16.msra.mxu0 %v2977_v27  ;;  %2126 = vmatprep.mubr.f32.mxu0 %v1850_v41  ;;  %v3015_v27 = vpack.c.bf16 %v1958_v24, %v1956_v23  ;;  %v3017_v37 = vpack.c.bf16 %v1957_v34, %v1955_v32  ;;  %v1961_v41 = vld [vmem:[#allocation18 + $0x370] sm:$0xff]  ;;  %v2156_v24 = vld [vmem:[#allocation19 + $0x58] sm:$0xff] }
 0x7f5   :  { %2980 = vmatprep.subr.bf16.mxu0 %v2979_v35  ;;  %v1960_v35 = vld [vmem:[#allocation18 + $0x368] sm:$0xff]  ;;  %v3021_v43 = vpack.c.bf16 %v1961_v41, %v1959_v40  ;;  %v1839_v44 = vmul.f32 1.442695, %v1833_v38  ;;  %v2167_v11 = vld [vmem:[#allocation19 + $0xb0] sm:$0xff]  ;;  %v3061_v32 = vpack.c.bf16 %v2156_v24, %v2155_v22  ;;  %v2176_v38 = vld [vmem:[#allocation19 + $0xf8] sm:$0xff] }
 0x7f6   :  { %v3019_v39 = vpack.c.bf16 %v1962_v36, %v1960_v35  ;;  %v3051_v13 = vpack.c.bf16 %v2168_v12, %v2167_v11  ;;  %v2157_v35 = vld [vmem:[#allocation19 + $0x60] sm:$0xff]  ;;  %v2158_v36 = vld [vmem:[#allocation19 + $0x68] sm:$0xff]  ;;  %v2159_v41 = vld [vmem:[#allocation19 + $0x70] sm:$0xff] }
 0x7f7   :  { %3165 = vpow2.f32 %v1839_v44  ;;  %v2271_v11 = vld [vmem:[#allocation21 + $0x58] sm:$0xff]  ;;  %v2272_v12 = vld [vmem:[#allocation21 + $0x60] sm:$0xff] }
 0x7f8   :  { %2982 = vmatpush1.bf16.msra.mxu0 %v2981_v2  ;;  %v1964_v2 = vld [vmem:[#allocation18 + $0x388] sm:$0xff] }
 0x7f9   :  { %2984 = vmatprep.subr.bf16.mxu0 %v2983_v42  ;;  %v1966_v42 = vld [vmem:[#allocation18 + $0x398] sm:$0xff] }
 0x7fa   :  { %v3023_v45 = vpack.c.bf16 %v1966_v42, %v1964_v2  ;;  %v2160_v2 = vld [vmem:[#allocation19 + $0x78] sm:$0xff] }
 0x7fb   :  { %v3069_v42 = vpack.c.bf16 %v2160_v2, %v2159_v41 }
 0x7fc   :  { %2986 = vmatpush1.bf16.msra.mxu0 %v2985_v47  ;;  %v1965_v47 = vld [vmem:[#allocation18 + $0x390] sm:$0xff] }
 0x7fd   :  { %2988 = vmatprep.subr.bf16.mxu0 %v2987_v48  ;;  %v1968_v48 = vld [vmem:[#allocation18 + $0x3a8] sm:$0xff]  ;;  %v3025_v50 = vpack.c.bf16 %v1965_v47, %v1963_v46 }
 0x7fe   :  { %v3027_v30 = vpack.c.bf16 %v1970_v49, %v1968_v48 }
 0x800   :  { %2990 = vmatpush1.bf16.msra.mxu0 %v2989_v51  ;;  %v1969_v51 = vld [vmem:[#allocation18 + $0x3b0] sm:$0xff] }
 0x801   :  { %2992 = vmatprep.subr.bf16.mxu0 %v2991_v52  ;;  %v1972_v52 = vld [vmem:[#allocation18 + $0x3c8] sm:$0xff]  ;;  %v3029_v55 = vpack.c.bf16 %v1969_v51, %v1967_v25 }
 0x802   :  { %v3031_v56 = vpack.c.bf16 %v1974_v53, %v1972_v52  ;;  %v2260_v53 = vld [vmem:[#allocation21] sm:$0xff] }
 0x804   :  { %2994 = vmatpush1.bf16.msra.mxu0 %v2993_v54  ;;  %v1973_v54 = vld [vmem:[#allocation18 + $0x3d0] sm:$0xff] }
 0x805   :  { %2996 = vmatprep.subr.bf16.mxu0 %v2995_v58  ;;  %v1976_v58 = vld [vmem:[#allocation18 + $0x3e8] sm:$0xff]  ;;  %v3033_v60 = vpack.c.bf16 %v1973_v54, %v1971_v57 }
 0x806   :  { %v3035_v61 = vpack.c.bf16 %v1978_v59, %v1976_v58  ;;  %v2262_v58 = vld [vmem:[#allocation21 + $0x10] sm:$0xff]  ;;  %v2263_v59 = vld [vmem:[#allocation21 + $0x18] sm:$0xff] }
 0x808   :  { %2998 = vmatpush1.bf16.msra.mxu0 %v2997_v63  ;;  %v1977_v63 = vld [vmem:[#allocation18 + $0x3f0] sm:$0xff] }
 0x809   :  { %3000 = vmatprep.subr.bf16.mxu0 %v2999_v3  ;;  %v3166_v3 = vpop.eup %3165  ;;  %v3037_v4 = vpack.c.bf16 %v1977_v63, %v1975_v62  ;;  %v2264_v62 = vld [vmem:[#allocation21 + $0x20] sm:$0xff]  ;;  %v2265_v63 = vld [vmem:[#allocation21 + $0x28] sm:$0xff] }
 0x80a   :  { %v2406_v5 = vadd.f32 -1.0, %v3166_v3  ;;  %v3078_v3 = vpack.c.bf16 %v2265_v63, %v2264_v62 }
 0x80c   :  { %3002 = vmatpush1.bf16.msra.mxu0 %v3001_v9  ;;  %v1849_v6 = vsel %vm1829_vm11, %v3923_v8, %v2406_v5  ;;  %v2150_v9 = vld [vmem:[#allocation19 + $0x28] sm:$0xff]  ;;  %v2171_v8 = vld [vmem:[#allocation19 + $0xd0] sm:$0xff]  ;;  %v2267_v5 = vld [vmem:[#allocation21 + $0x38] sm:$0xff] }
 0x80d   :  { %3004 = vmatprep.subr.bf16.mxu0 %v3003_v10  ;;  %v3049_v10 = vpack.c.bf16 %v2150_v9, %v2149_v7  ;;  %v3059_v23 = vpack.c.bf16 %v2172_v21, %v2171_v8  ;;  %v2268_v7 = vld [vmem:[#allocation21 + $0x40] sm:$0xff]  ;;  %v2269_v9 = vld [vmem:[#allocation21 + $0x48] sm:$0xff] }
 0x80f   :  { %3050 = vmatpush3.bf16.msra.mxu1 %v3049_v10  ;;  %v2270_v10 = vld [vmem:[#allocation21 + $0x50] sm:$0xff] }
 0x810   :  { %3006 = vmatpush1.bf16.msra.mxu0 %v3005_v15  ;;  %v2152_v15 = vld [vmem:[#allocation19 + $0x38] sm:$0xff]  ;;  %3052 = vmatprep.subr.bf16.mxu1 %v3051_v13  ;;  %v3087_v13 = vpack.c.bf16 %v2271_v11, %v2270_v10 }
 0x811   :  { %3008 = vmatprep.subr.bf16.mxu0 %v3007_v16  ;;  %v3053_v16 = vpack.c.bf16 %v2152_v15, %v2151_v14  ;;  %v2273_v14 = vld [vmem:[#allocation21 + $0x68] sm:$0xff] }
 0x812   :  { %v3090_v15 = vpack.c.bf16 %v2273_v14, %v2272_v12 }
 0x813   :  { %3054 = vmatpush3.bf16.msra.mxu1 %v3053_v16  ;;  %v2274_v16 = vld [vmem:[#allocation21 + $0x70] sm:$0xff] }
 0x814   :  { %3010 = vmatpush1.bf16.msra.mxu0 %v3009_v19  ;;  %v2154_v19 = vld [vmem:[#allocation19 + $0x48] sm:$0xff]  ;;  %3056 = vmatprep.subr.bf16.mxu1 %v3055_v28  ;;  %v3093_v18 = vpack.c.bf16 %v2275_v17, %v2274_v16 }
 0x815   :  { %3012 = vmatprep.subr.bf16.mxu0 %v3011_v20  ;;  %v3057_v20 = vpack.c.bf16 %v2154_v19, %v2153_v33  ;;  %v2410_v33 = vld [vmem:[%s3967_s15 + $0xf] ss:$0 sm:$0xff] }
 0x817   :  { %3058 = vmatpush3.bf16.msra.mxu1 %v3057_v20 }
 0x818   :  { %3014 = vmatpush1.bf16.msra.mxu0 %v3013_v26  ;;  %v2173_v26 = vld [vmem:[#allocation19 + $0xe0] sm:$0xff]  ;;  %3060 = vmatprep.subr.bf16.mxu1 %v3059_v23 }
 0x819   :  { %3016 = vmatprep.subr.bf16.mxu0 %v3015_v27  ;;  %v2174_v27 = vld [vmem:[#allocation19 + $0xe8] sm:$0xff] }
 0x81a   :  { %v3063_v34 = vpack.c.bf16 %v2174_v27, %v2173_v26 }
 0x81b   :  { %3062 = vmatpush3.bf16.msra.mxu1 %v3061_v32 }
 0x81c   :  { %3018 = vmatpush1.bf16.msra.mxu0 %v3017_v37  ;;  %v2175_v37 = vld [vmem:[#allocation19 + $0xf0] sm:$0xff]  ;;  %3064 = vmatprep.subr.bf16.mxu1 %v3063_v34 }
 0x81d   :  { %3020 = vmatprep.subr.bf16.mxu0 %v3019_v39  ;;  %v3065_v39 = vpack.c.bf16 %v2158_v36, %v2157_v35  ;;  %v3067_v40 = vpack.c.bf16 %v2176_v38, %v2175_v37 }
 0x81f   :  { %3066 = vmatpush3.bf16.msra.mxu1 %v3065_v39 }
 0x820   :  { %3022 = vmatpush1.bf16.msra.mxu0 %v3021_v43  ;;  %3068 = vmatprep.subr.bf16.mxu1 %v3067_v40  ;;  %v1979_v43 = vld [vmem:[%s3967_s15 + $0xd] sm:$0x3] }
 0x821   :  { %3024 = vmatprep.subr.bf16.mxu0 %v3023_v45  ;;  %v1984_v44 = vrot.slane %v1979_v43, %v3841_v29  ;;  %v1988_v45 = vrot.slane %v1979_v43, %v3844_v31 }
 0x823   :  { %3070 = vmatpush3.bf16.msra.mxu1 %v3069_v42 }
 0x824   :  { %3026 = vmatpush1.bf16.msra.mxu0 %v3025_v50  ;;  %3071 = vmatprep.subr.bf16.mxu1 %v3494_v0 }
 0x825   :  { %3028 = vmatprep.subr.bf16.mxu0 %v3027_v30 }
 0x828   :  { %3030 = vmatpush1.bf16.msra.mxu0 %v3029_v55  ;;  %v2261_v55 = vld [vmem:[#allocation21 + $0x8] sm:$0xff] }
 0x829   :  { %3032 = vmatprep.subr.bf16.mxu0 %v3031_v56  ;;  %v3072_v29 = vpack.c.bf16 %v2261_v55, %v2260_v53 }
 0x82c   :  { %3034 = vmatpush1.bf16.msra.mxu0 %v3033_v60 }
 0x82d   :  { %3036 = vmatprep.subr.bf16.mxu0 %v3035_v61  ;;  %v3075_v61 = vpack.c.bf16 %v2263_v59, %v2262_v58 }
 0x830   :  { %3038 = vmatpush1.bf16.msra.mxu0 %v3037_v4  ;;  %v2266_v4 = vld [vmem:[#allocation21 + $0x30] sm:$0xff] }
 0x833   :  { %2127 = vmatmul.mubr.f32.vlgmr.msra.gmra.mrb[10].mxu0 %v1849_v6  ;;  %v3081_v6 = vpack.c.bf16 %v2267_v5, %v2266_v4 }
 0x906   :  { %v2128_v46 = vpop.f32.mrb[10].mxu0 }
 0x907   :  { %v3095_v47 = vadd.f32 %v2128_v46, %v1984_v44  ;;  %v2130_v48 = vpop.f32.mrb[11].mxu0 }
 0x908   :  { %v3096_v49 = vadd.f32 %v2130_v48, %v1988_v45 }
 0x909   :  { %v2135_v50 = vmin.f32 %v3095_v47, 0.0  ;;  %vm2133_vm13 = vcmp.gt.f32.partialorder %v3095_v47, 0.0 }
 0x90a   :  { %v2136_v30 = vmin.f32 %v3096_v49, 0.0  ;;  %vm2134_vm12 = vcmp.gt.f32.partialorder %v3096_v49, 0.0 }
 0x90b   :  { %v2137_v25 = vmul.f32 1.442695, %v2135_v50 }
 0x90c   :  { %v2139_v51 = vmul.f32 1.442695, %v2136_v30 }
 0x90d   :  { %3167 = vpow2.f32 %v2137_v25 }
 0x90e   :  { %3169 = vpow2.f32 %v2139_v51 }
 0x917   :  { %v3168_v52 = vpop.eup %3167 }
 0x918   :  { %v3170_v56 = vpop.eup %3169  ;;  %v2408_v57 = vadd.f32 -1.0, %v3168_v52 }
 0x919   :  { %v2409_v54 = vadd.f32 -1.0, %v3170_v56 }
 0x91a   :  { %v2143_v60 = vsel %vm2133_vm13, %v3095_v47, %v2408_v57 }
 0x91b   :  { %v2144_v31 = vsel %vm2134_vm12, %v3096_v49, %v2409_v54 }
 0x91c   :  { %2248 = vmatprep.mubr.f32.mxu1 %v2144_v31 }
 0x91d   :  { %2249 = vmatmul.mubr.f32.vlgmr.msra.gmra.mrb[12].mxu1 %v2143_v60 }
 0x91e   :  { %3073 = vmatpush3.bf16.msra.mxu1 %v3072_v29  ;;  %2700 = vmatprep.mubr.msk.f32.mxu1 %vm3495_vm0, %v3496_v1  ;;  %v3084_v1 = vpack.c.bf16 %v2269_v9, %v2268_v7 }
 0x91f   :  { %3074 = vmatprep.subr.bf16.mxu1 %v3494_v0 }
 0x922   :  { %3076 = vmatpush3.bf16.msra.mxu1 %v3075_v61 }
 0x923   :  { %3077 = vmatprep.subr.bf16.mxu1 %v3494_v0 }
 0x926   :  { %3079 = vmatpush3.bf16.msra.mxu1 %v3078_v3 }
 0x927   :  { %3080 = vmatprep.subr.bf16.mxu1 %v3494_v0 }
 0x92a   :  { %3082 = vmatpush3.bf16.msra.mxu1 %v3081_v6 }
 0x92b   :  { %3083 = vmatprep.subr.bf16.mxu1 %v3494_v0 }
 0x92e   :  { %3085 = vmatpush3.bf16.msra.mxu1 %v3084_v1 }
 0x92f   :  { %3086 = vmatprep.subr.bf16.mxu1 %v3494_v0 }
 0x932   :  { %3088 = vmatpush3.bf16.msra.mxu1 %v3087_v13 }
 0x933   :  { %3089 = vmatprep.subr.bf16.mxu1 %v3494_v0 }
 0x936   :  { %3091 = vmatpush3.bf16.msra.mxu1 %v3090_v15 }
 0x937   :  { %3092 = vmatprep.subr.bf16.mxu1 %v3494_v0  ;;  %v2412_v0 = vld [vmem:[%s3967_s15 + $0x10] ss:$0 sm:$0xff] }
 0x93a   :  { %3094 = vmatpush3.bf16.msra.mxu1 %v3093_v18 }
 0x9f0   :  { %v2534_v28 = vpop.f32.mrb[12].mxu1 }
 0x9f1   :  { %v2535_v19 = vpop.f32.mrb[13].mxu1 }
 0x9f2   :  { %v2536_v20 = vadd.f32 %v2535_v19, %v2534_v28 }
 0x9f4   :  { %v2251_v8 = vadd.f32 %v2536_v20, %v2410_v33 }
 0x9f6   :  { %v2255_v21 = vmin.f32 %v2251_v8, 0.0  ;;  %vm2254_vm0 = vcmp.gt.f32.partialorder %v2251_v8, 0.0 }
 0x9f8   :  { %v2256_v22 = vmul.f32 1.442695, %v2255_v21 }
 0x9fa   :  { %3171 = vpow2.f32 %v2256_v22 }
 0xa04   :  { %v3172_v23 = vpop.eup %3171 }
 0xa05   :  { %v2411_v24 = vadd.f32 -1.0, %v3172_v23 }
 0xa07   :  { %v2259_v26 = vsel %vm2254_vm0, %v2251_v8, %v2411_v24 }
 0xa08   :  { %2701 = vmatmul.mubr.f32.vlgmr.msra.gmra.mrb[14].mxu1 %v2259_v26 }
 0xadb   :  { %v2349_v27 = vpop.f32.mrb[14].mxu1 }
 0xadc   :  { %v2350_v32 = vadd.f32 %v2412_v0, %v2349_v27  ;;  %v2702_v34 = vpop.f32.mrb[15].mxu1 }
 0xade   :  { %2353 = vst [vmem:[%s3968_s16] sm:$0xff] %v2350_v32 }
 0xadf   :  { %2358 = vsyncpa [#allocation3], 1 }
 0xae0   :  { %2359 = vsyncpa [#allocation5], 1 }
 0xae1   :  { %2360 = vsyncpa [#allocation8], 1 }
 0xae2   :  { %2361 = vsyncpa [#allocation11], 1 }
 0xae3   :  { %2362 = vsyncpa [#allocation14], 1 }
 0xae4   :  { %2363 = vsyncpa [#allocation17], 1 }
 0xae5   :  { %2364 = vsyncpa [#allocation20], 1 }

</bundles_post_ra>
